<compile_context>
chip_gen: v7x
topology: tpu7x:2x2x1
jax: 0.10.0
libtpu: 0.0.40
codegen_flags: <defaults>
</compile_context>

<pallas_src>
import functools
import math
import types

import jax
import jax.numpy as jnp
import numpy as np
from jax.experimental import pallas as pl
from jax.experimental.pallas import tpu as pltpu

_VMEM_LIMIT = 32 * 1024 * 1024  # safe on v5e/v6e (128 MiB) and v7x (64 MiB)


def _round_up(x, m):
    return ((x + m - 1) // m) * m


def _gelu_tanh(x):
    # tanh-form GELU: most of the work lands on the EUP instead of the VALU.
    c = math.sqrt(2.0 / math.pi)
    return 0.5 * x * (1.0 + jnp.tanh(c * (x + 0.044715 * x * x * x)))


# -----------------------------------------------------------------------------
# Kernel 1: fused front-end (framing -> DFT power -> mel -> dB)
# -----------------------------------------------------------------------------
def _frontend_kernel(hb_ref, win_ref, dft_ref, mel_ref, o_ref, *, num_frames):
    hb = hb_ref[...]                                        # (nf+1, hop) f32
    # 50%-overlap framing in VMEM: frame t = [hb[t] ++ hb[t+1]]
    frames = jnp.concatenate([hb[:num_frames, :], hb[1:num_frames + 1, :]],
                             axis=1)                        # (nf, n_fft)
    f = (frames * win_ref[...]).astype(jnp.bfloat16)
    # one matmul against [cos | -sin]
    spec = jnp.dot(f, dft_ref[...], preferred_element_type=jnp.float32)
    nfp = dft_ref.shape[1] // 2
    re = spec[:, :nfp]
    im = spec[:, nfp:]
    power = re * re + im * im                # lane-padded freq bins are exact 0
    mel = jnp.dot(power.astype(jnp.bfloat16), mel_ref[...],
                  preferred_element_type=jnp.float32)       # (nf, n_mels_pad)
    # AmplitudeToDB (stype='power', ref=1.0, top_db=None)
    o_ref[...] = (10.0 / math.log(10.0)) * jnp.log(jnp.maximum(mel, 1e-10))


def melspectrogram_db(hb, window, dft, mel_fb, num_frames):
    B, nfp1, hop = hb.shape
    n_fft = window.shape[1]
    n_mels_pad = mel_fb.shape[1]
    return pl.pallas_call(
        functools.partial(_frontend_kernel, num_frames=num_frames),
        grid=(B,),
        in_specs=[pl.BlockSpec((None, nfp1, hop), lambda b: (b, 0, 0)),
                  pl.BlockSpec((1, n_fft), lambda b: (0, 0)),
                  pl.BlockSpec(dft.shape, lambda b: (0, 0)),
                  pl.BlockSpec(mel_fb.shape, lambda b: (0, 0))],
        out_specs=pl.BlockSpec((None, num_frames, n_mels_pad),
                               lambda b: (b, 0, 0)),
        out_shape=jax.ShapeDtypeStruct((B, num_frames, n_mels_pad), jnp.float32),
        compiler_params=pltpu.CompilerParams(
            dimension_semantics=("parallel",),
            vmem_limit_bytes=_VMEM_LIMIT),
    )(hb, window, dft, mel_fb)


# -----------------------------------------------------------------------------
# Kernel 2: whole transformer (patch-embed prologue + all layers + MLP head)
# -----------------------------------------------------------------------------
def _transformer_kernel(patches_ref, proj_w_ref, proj_b_ref, poscls_ref,
                        wqkv_ref, bqkv_ref, wo_ref, bo_ref,
                        ln1g_ref, ln1b_ref, wff1_ref, bff1_ref,
                        wff2_ref, bff2_ref, ln2g_ref, ln2b_ref,
                        hlng_ref, hlnb_ref, whead_ref, bhead_ref,
                        logits_ref, h_ref, *, num_heads, eps):
    l = pl.program_id(1)
    E = h_ref.shape[1]
    head_dim = E // num_heads
    scale = 1.0 / math.sqrt(head_dim)

    # --- layer-0 prologue: patch projection + cls token + positional embed ---
    @pl.when(l == 0)
    def _():
        emb = jnp.dot(patches_ref[...].astype(jnp.bfloat16), proj_w_ref[...],
                      preferred_element_type=jnp.float32) + proj_b_ref[...]
        seq = jnp.concatenate(
            [jnp.zeros((1, E), jnp.float32), emb], axis=0)      # (S, E)
        h_ref[...] = seq + poscls_ref[...]

    h = h_ref[...]                                              # (S, E) f32
    h_bf = h.astype(jnp.bfloat16)

    # --- fused QKV projection: one lane-dense (S,E)@(E,3E) matmul ---
    qkv = (jnp.dot(h_bf, wqkv_ref[...], preferred_element_type=jnp.float32)
           + bqkv_ref[...])                                     # (S, 3E)
    q = qkv[:, :E] * scale
    k = qkv[:, E:2 * E]
    v = qkv[:, 2 * E:]

    # --- per-head scores / softmax / PV only; concat heads, one out-proj ---
    heads_out = []
    for hh in range(num_heads):
        sl = slice(hh * head_dim, (hh + 1) * head_dim)
        s = jax.lax.dot_general(q[:, sl], k[:, sl], (((1,), (1,)), ((), ())),
                                preferred_element_type=jnp.float32)   # (S, S)
        m = jnp.max(s, axis=-1, keepdims=True)
        p = jnp.exp(s - m)
        p = p * pl.reciprocal(jnp.sum(p, axis=-1, keepdims=True), approx=True)
        heads_out.append(jnp.dot(p, v[:, sl],
                                 preferred_element_type=jnp.float32))
    ctx = jnp.concatenate(heads_out, axis=-1)                   # (S, E)
    attn = (jnp.dot(ctx.astype(jnp.bfloat16), wo_ref[...],
                    preferred_element_type=jnp.float32) + bo_ref[...])

    # --- residual + LayerNorm 1 (post-norm, f32 statistics) ---
    z = h + attn
    mu = jnp.mean(z, axis=-1, keepdims=True)
    var = jnp.mean((z - mu) ** 2, axis=-1, keepdims=True)
    h1 = (z - mu) * jax.lax.rsqrt(var + eps) * ln1g_ref[...] + ln1b_ref[...]

    # --- feed-forward: Linear -> GELU(tanh) -> Linear ---
    f = (jnp.dot(h1.astype(jnp.bfloat16), wff1_ref[...],
                 preferred_element_type=jnp.float32) + bff1_ref[...])
    f = _gelu_tanh(f)
    f = (jnp.dot(f.astype(jnp.bfloat16), wff2_ref[...],
                 preferred_element_type=jnp.float32) + bff2_ref[...])

    # --- residual + LayerNorm 2 ---
    z2 = h1 + f
    mu2 = jnp.mean(z2, axis=-1, keepdims=True)
    var2 = jnp.mean((z2 - mu2) ** 2, axis=-1, keepdims=True)
    h2 = (z2 - mu2) * jax.lax.rsqrt(var2 + eps) * ln2g_ref[...] + ln2b_ref[...]
    h_ref[...] = h2

    # --- last-layer epilogue: fused LayerNorm + Linear MLP head on cls row ---
    @pl.when(l == pl.num_programs(1) - 1)
    def _():
        cls = h2[0:1, :]                                        # (1, E)
        mh = jnp.mean(cls, axis=-1, keepdims=True)
        vh = jnp.mean((cls - mh) ** 2, axis=-1, keepdims=True)
        cn = (cls - mh) * jax.lax.rsqrt(vh + eps) * hlng_ref[...] + hlnb_ref[...]
        logits_ref[...] = (jnp.dot(cn.astype(jnp.bfloat16), whead_ref[...],
                                   preferred_element_type=jnp.float32)
                           + bhead_ref[...])


def transformer_forward(patches, proj_w, proj_b, poscls, stack, head,
                        *, num_heads, eps=1e-5):
    B, N, Kp = patches.shape
    S, E = poscls.shape
    L = stack["wqkv"].shape[0]
    hid = stack["wff1"].shape[2]
    Cp = head["w"].shape[1]

    def per_batch(b, l):
        return (b, 0, 0)

    def per_layer(b, l):
        return (l, 0, 0)

    def const2(b, l):
        return (0, 0)

    in_specs = [
        pl.BlockSpec((None, N, Kp), per_batch),       # patches
        pl.BlockSpec((Kp, E), const2),                # proj_w
        pl.BlockSpec((1, E), const2),                 # proj_b
        pl.BlockSpec((S, E), const2),                 # cls + pos embed
        pl.BlockSpec((None, E, 3 * E), per_layer),    # wqkv
        pl.BlockSpec((None, 1, 3 * E), per_layer),    # bqkv
        pl.BlockSpec((None, E, E), per_layer),        # wo
        pl.BlockSpec((None, 1, E), per_layer),        # bo
        pl.BlockSpec((None, 1, E), per_layer),        # ln1_g
        pl.BlockSpec((None, 1, E), per_layer),        # ln1_b
        pl.BlockSpec((None, E, hid), per_layer),      # wff1
        pl.BlockSpec((None, 1, hid), per_layer),      # bff1
        pl.BlockSpec((None, hid, E), per_layer),      # wff2
        pl.BlockSpec((None, 1, E), per_layer),        # bff2
        pl.BlockSpec((None, 1, E), per_layer),        # ln2_g
        pl.BlockSpec((None, 1, E), per_layer),        # ln2_b
        pl.BlockSpec((1, E), const2),                 # head ln gamma
        pl.BlockSpec((1, E), const2),                 # head ln beta
        pl.BlockSpec((E, Cp), const2),                # head weight
        pl.BlockSpec((1, Cp), const2),                # head bias
    ]
    return pl.pallas_call(
        functools.partial(_transformer_kernel, num_heads=num_heads, eps=eps),
        grid=(B, L),
        in_specs=in_specs,
        out_specs=pl.BlockSpec((None, 1, Cp), per_batch),
        out_shape=jax.ShapeDtypeStruct((B, 1, Cp), jnp.float32),
        scratch_shapes=[pltpu.VMEM((S, E), jnp.float32)],
        compiler_params=pltpu.CompilerParams(
            dimension_semantics=("parallel", "arbitrary"),
            vmem_limit_bytes=_VMEM_LIMIT),
    )(patches, proj_w, proj_b, poscls,
      stack["wqkv"], stack["bqkv"], stack["wo"], stack["bo"],
      stack["ln1_g"], stack["ln1_b"], stack["wff1"], stack["bff1"],
      stack["wff2"], stack["bff2"], stack["ln2_g"], stack["ln2_b"],
      head["ln_g"], head["ln_b"], head["w"], head["b"])


# -----------------------------------------------------------------------------
# Parameter / constant construction (deterministic, in-script)
# -----------------------------------------------------------------------------
def _hz_to_mel(f):
    return 2595.0 * np.log10(1.0 + f / 700.0)


def _mel_to_hz(m):
    return 700.0 * (10.0 ** (m / 2595.0) - 1.0)


def mel_filterbank(n_freq, n_mels, sample_rate):
    """torchaudio-style HTK mel filterbank, norm=None. Returns (n_freq, n_mels)."""
    all_freqs = np.linspace(0.0, sample_rate / 2.0, n_freq)
    m_pts = np.linspace(_hz_to_mel(0.0), _hz_to_mel(sample_rate / 2.0), n_mels + 2)
    f_pts = _mel_to_hz(m_pts)
    f_diff = f_pts[1:] - f_pts[:-1]
    slopes = f_pts[None, :] - all_freqs[:, None]
    down = -slopes[:, :-2] / f_diff[:-1]
    up = slopes[:, 2:] / f_diff[1:]
    return np.maximum(0.0, np.minimum(down, up)).astype(np.float32)


def xavier_uniform(key, shape):
    fan_in, fan_out = shape
    limit = math.sqrt(6.0 / (fan_in + fan_out))
    return jax.random.uniform(key, shape, jnp.float32, -limit, limit)


def init_params(key, cfg):
    n_freq = cfg.n_fft // 2 + 1
    nf_pad = _round_up(n_freq, 128)
    n_mels_pad = _round_up(cfg.n_mels, 128)

    # concatenated [cos | -sin] DFT basis, zero-padded to lane-aligned width
    n = np.arange(cfg.n_fft, dtype=np.float64)[:, None]
    kk = np.arange(n_freq, dtype=np.float64)[None, :]
    ang = 2.0 * np.pi * n * kk / cfg.n_fft
    dft = np.zeros((cfg.n_fft, 2 * nf_pad), np.float32)
    dft[:, :n_freq] = np.cos(ang)
    dft[:, nf_pad:nf_pad + n_freq] = -np.sin(ang)
    mel = np.zeros((nf_pad, n_mels_pad), np.float32)
    mel[:n_freq, :cfg.n_mels] = mel_filterbank(n_freq, cfg.n_mels, cfg.sample_rate)

    params = {
        "window": jnp.asarray(                      # periodic Hann
            0.5 - 0.5 * np.cos(2.0 * np.pi * np.arange(cfg.n_fft) / cfg.n_fft),
            jnp.float32).reshape(1, cfg.n_fft),
        "dft": jnp.asarray(dft, jnp.bfloat16),
        "mel_fb": jnp.asarray(mel, jnp.bfloat16),
    }

    patch_dim = cfg.patch_time * cfg.patch_freq               # in_channels = 1
    k_pad = _round_up(patch_dim, 128)
    E, L, hid = cfg.emb_dim, cfg.num_layers, cfg.hidden_dim
    C = cfg.num_classes
    c_pad = _round_up(C, 128)

    ks = iter(jax.random.split(key, 8 + 4 * L))

    pw = jnp.zeros((k_pad, E), jnp.float32).at[:patch_dim].set(
        xavier_uniform(next(ks), (patch_dim, E)))
    params["proj_w"] = pw.astype(jnp.bfloat16)
    params["proj_b"] = jnp.zeros((1, E), jnp.float32)
    params["cls_token"] = 0.02 * jax.random.normal(next(ks), (1, E), jnp.float32)
    params["pos_embed"] = 0.02 * jax.random.normal(next(ks), (500, E), jnp.float32)

    wqkv = jnp.stack([xavier_uniform(next(ks), (E, 3 * E)) for _ in range(L)])
    wo = jnp.stack([xavier_uniform(next(ks), (E, E)) for _ in range(L)])
    wff1 = jnp.stack([xavier_uniform(next(ks), (E, hid)) for _ in range(L)])
    wff2 = jnp.stack([xavier_uniform(next(ks), (hid, E)) for _ in range(L)])
    params["stack"] = {
        "wqkv": wqkv.astype(jnp.bfloat16),
        "bqkv": jnp.zeros((L, 1, 3 * E), jnp.float32),
        "wo": wo.astype(jnp.bfloat16),
        "bo": jnp.zeros((L, 1, E), jnp.float32),
        "ln1_g": jnp.ones((L, 1, E), jnp.float32),
        "ln1_b": jnp.zeros((L, 1, E), jnp.float32),
        "wff1": wff1.astype(jnp.bfloat16),
        "bff1": jnp.zeros((L, 1, hid), jnp.float32),
        "wff2": wff2.astype(jnp.bfloat16),
        "bff2": jnp.zeros((L, 1, E), jnp.float32),
        "ln2_g": jnp.ones((L, 1, E), jnp.float32),
        "ln2_b": jnp.zeros((L, 1, E), jnp.float32),
    }

    wh = jnp.zeros((E, c_pad), jnp.float32).at[:, :C].set(
        xavier_uniform(next(ks), (E, C)))
    params["head"] = {
        "ln_g": jnp.ones((1, E), jnp.float32),
        "ln_b": jnp.zeros((1, E), jnp.float32),
        "w": wh.astype(jnp.bfloat16),
        "b": jnp.zeros((1, c_pad), jnp.float32),
    }
    return params


# -----------------------------------------------------------------------------
# Forward pass (2 Pallas launches + tiny XLA glue)
# -----------------------------------------------------------------------------
def make_forward(cfg):
    eps = 1e-5
    # in-kernel framing assumes standard 50% overlap (module defaults: 1024/512)
    assert cfg.n_fft == 2 * cfg.hop_length

    def forward(params, waveforms):
        B = waveforms.shape[0]
        wave = waveforms.reshape(B, -1)                         # channel = 1
        # --- reflect pad (center=True) + hop-block view: XLA glue ---
        pad = cfg.n_fft // 2
        padded = jnp.pad(wave, ((0, 0), (pad, pad)), mode="reflect")
        num_frames = 1 + wave.shape[1] // cfg.hop_length
        hb = padded[:, :(num_frames + 1) * cfg.hop_length].reshape(
            B, num_frames + 1, cfg.hop_length)

        # --- kernel 1: framing + STFT power + mel + dB (lane-dense output) ---
        mel_db = melspectrogram_db(hb, params["window"], params["dft"],
                                   params["mel_fb"], num_frames)
        x = mel_db[:, :, :cfg.n_mels]                           # (B, T, F)

        # --- PatchEmbed unfold equivalent (reshape glue, K padded to 128) ---
        pt, pf = cfg.patch_time, cfg.patch_freq
        T, F = num_frames, cfg.n_mels
        patches = x.reshape(B, T // pt, pt, F // pf, pf)
        patches = jnp.transpose(patches, (0, 1, 3, 2, 4)).reshape(B, -1, pt * pf)
        k_pad = params["proj_w"].shape[0]
        patches = jnp.pad(patches, ((0, 0), (0, 0), (0, k_pad - pt * pf)))
        N = patches.shape[1]
        S = N + 1
        poscls = jnp.concatenate(
            [params["pos_embed"][0:1] + params["cls_token"],
             params["pos_embed"][1:S]], axis=0)                 # (S, E)

        # --- kernel 2: patch proj + all encoder layers + MLP head, fused ---
        logits = transformer_forward(patches, params["proj_w"], params["proj_b"],
                                     poscls, params["stack"], params["head"],
                                     num_heads=cfg.num_heads, eps=eps)
        return logits[:, 0, :cfg.num_classes]

    return jax.jit(forward)


# -----------------------------------------------------------------------------
# Main
# -----------------------------------------------------------------------------
if __name__ == "__main__":
    # Small config consistent with the module (time frames divisible by
    # patch_time, n_mels divisible by patch_freq); num_layers=2 to keep it small.
    cfg = types.SimpleNamespace(
        sample_rate=16000, n_mels=64, n_fft=256, hop_length=128,
        patch_time=6, patch_freq=16, emb_dim=128, num_heads=4,
        num_layers=2, num_classes=10, hidden_dim=256,
    )
    key = jax.random.PRNGKey(0)
    pkey, xkey = jax.random.split(key)
    params = init_params(pkey, cfg)

    B = 2
    num_samples = cfg.hop_length * 11          # -> 12 frames, 12 % patch_time == 0
    waveforms = jax.random.normal(xkey, (B, 1, num_samples), jnp.float32)

    forward = make_forward(cfg)
    logits = forward(params, waveforms)
    jax.block_until_ready(logits)
    assert logits.shape == (B, cfg.num_classes)
    assert bool(jnp.all(jnp.isfinite(logits)))
    print("KERNEL_OK")
</pallas_src>

<mosaic_0001>
module attributes {stable_mosaic.version = 11 : i64} {
  func.func @_frontend_kernel(%arg0: i32, %arg1: memref<1x13x128xf32, #tpu.memory_space<vmem>>, %arg2: memref<1x256xf32, #tpu.memory_space<vmem>>, %arg3: memref<256x512xbf16, #tpu.memory_space<vmem>>, %arg4: memref<256x128xbf16, #tpu.memory_space<vmem>>, %arg5: memref<1x12x128xf32, #tpu.memory_space<vmem>>) attributes {dimension_semantics = [#tpu.dimension_semantics<parallel>], iteration_bounds = array<i64: 2>, scalar_prefetch = 0 : i64, scratch_operands = 0 : i64, tpu.core_type = #tpu.core_type<tc>, window_params = [{transform_indices = @transform_0, window_bounds = array<i64: 1, 13, 128>}, {pipeline_mode = #tpu.pipeline_mode<synchronous>, transform_indices = @transform_1, window_bounds = array<i64: 1, 256>}, {pipeline_mode = #tpu.pipeline_mode<synchronous>, transform_indices = @transform_2, window_bounds = array<i64: 256, 512>}, {pipeline_mode = #tpu.pipeline_mode<synchronous>, transform_indices = @transform_3, window_bounds = array<i64: 256, 128>}, {transform_indices = @transform_4, window_bounds = array<i64: 1, 12, 128>}]} {
    %c0 = arith.constant 0 : index
    %c0_0 = arith.constant 0 : index
    %c0_1 = arith.constant 0 : index
    %0 = vector.load %arg1[%c0, %c0_0, %c0_1] : memref<1x13x128xf32, #tpu.memory_space<vmem>>, vector<1x13x128xf32>
    %1 = vector.shape_cast %0 : vector<1x13x128xf32> to vector<13x128xf32>
    %2 = vector.extract_strided_slice %1 {offsets = [0, 0], sizes = [12, 128], strides = [1, 1]} : vector<13x128xf32> to vector<12x128xf32>
    %3 = vector.extract_strided_slice %1 {offsets = [1, 0], sizes = [12, 128], strides = [1, 1]} : vector<13x128xf32> to vector<12x128xf32>
    %4 = tpu.concatenate %2, %3 in 1 : vector<12x128xf32>, vector<12x128xf32> -> vector<12x256xf32>
    %c0_2 = arith.constant 0 : index
    %c0_3 = arith.constant 0 : index
    %5 = vector.load %arg2[%c0_2, %c0_3] : memref<1x256xf32, #tpu.memory_space<vmem>>, vector<1x256xf32>
    %6 = vector.broadcast %5 : vector<1x256xf32> to vector<12x256xf32>
    %7 = arith.mulf %4, %6 : vector<12x256xf32>
    %8 = arith.truncf %7 : vector<12x256xf32> to vector<12x256xbf16>
    %c0_4 = arith.constant 0 : index
    %c0_5 = arith.constant 0 : index
    %9 = vector.load %arg3[%c0_4, %c0_5] : memref<256x512xbf16, #tpu.memory_space<vmem>>, vector<256x512xbf16>
    %cst = arith.constant dense<0.000000e+00> : vector<12x512xf32>
    %10 = tpu.matmul %8, %9, %cst {dimension_numbers = #tpu.dot_dimension_numbers<[1], [0], [0], [1], [0, 0, 1, 1], [], []>} : vector<12x256xbf16>, vector<256x512xbf16>, vector<12x512xf32> -> vector<12x512xf32>
    %11 = vector.extract_strided_slice %10 {offsets = [0, 0], sizes = [12, 256], strides = [1, 1]} : vector<12x512xf32> to vector<12x256xf32>
    %12 = vector.extract_strided_slice %10 {offsets = [0, 256], sizes = [12, 256], strides = [1, 1]} : vector<12x512xf32> to vector<12x256xf32>
    %13 = arith.mulf %11, %11 : vector<12x256xf32>
    %14 = arith.mulf %12, %12 : vector<12x256xf32>
    %15 = arith.addf %13, %14 : vector<12x256xf32>
    %16 = arith.truncf %15 : vector<12x256xf32> to vector<12x256xbf16>
    %c0_6 = arith.constant 0 : index
    %c0_7 = arith.constant 0 : index
    %17 = vector.load %arg4[%c0_6, %c0_7] : memref<256x128xbf16, #tpu.memory_space<vmem>>, vector<256x128xbf16>
    %cst_8 = arith.constant dense<0.000000e+00> : vector<12x128xf32>
    %18 = tpu.matmul %16, %17, %cst_8 {dimension_numbers = #tpu.dot_dimension_numbers<[1], [0], [0], [1], [0, 0, 1, 1], [], []>} : vector<12x256xbf16>, vector<256x128xbf16>, vector<12x128xf32> -> vector<12x128xf32>
    %cst_9 = arith.constant 1.000000e-10 : f32
    %19 = vector.broadcast %cst_9 : f32 to vector<12x128xf32>
    %20 = arith.maximumf %18, %19 : vector<12x128xf32>
    %21 = math.log %20 : vector<12x128xf32>
    %cst_10 = arith.constant 4.34294462 : f32
    %22 = vector.broadcast %cst_10 : f32 to vector<12x128xf32>
    %23 = arith.mulf %22, %21 : vector<12x128xf32>
    %c0_11 = arith.constant 0 : index
    %c0_12 = arith.constant 0 : index
    %c0_13 = arith.constant 0 : index
    %24 = vector.load %arg5[%c0_11, %c0_12, %c0_13] : memref<1x12x128xf32, #tpu.memory_space<vmem>>, vector<1x12x128xf32>
    %25 = vector.shape_cast %24 : vector<1x12x128xf32> to vector<12x128xf32>
    %26 = vector.shape_cast %23 : vector<12x128xf32> to vector<1x12x128xf32>
    tpu.vector_store %arg5[%c0_11, %c0_12, %c0_13], %26 {strides = array<i32>} : memref<1x12x128xf32, #tpu.memory_space<vmem>>, vector<1x12x128xf32>,
    return
  }
  func.func @transform_0(%arg0: i32) -> (i32, i32, i32) {
    %c0_i32 = arith.constant 0 : i32
    %c0_i32_0 = arith.constant 0 : i32
    %c0_i32_1 = arith.constant 0 : i32
    return %arg0, %c0_i32, %c0_i32_0 : i32, i32, i32
  }
  func.func @transform_1(%arg0: i32) -> (i32, i32) {
    %c0_i32 = arith.constant 0 : i32
    %c0_i32_0 = arith.constant 0 : i32
    %c0_i32_1 = arith.constant 0 : i32
    return %c0_i32, %c0_i32_0 : i32, i32
  }
  func.func @transform_2(%arg0: i32) -> (i32, i32) {
    %c0_i32 = arith.constant 0 : i32
    %c0_i32_0 = arith.constant 0 : i32
    %c0_i32_1 = arith.constant 0 : i32
    return %c0_i32, %c0_i32_0 : i32, i32
  }
  func.func @transform_3(%arg0: i32) -> (i32, i32) {
    %c0_i32 = arith.constant 0 : i32
    %c0_i32_0 = arith.constant 0 : i32
    %c0_i32_1 = arith.constant 0 : i32
    return %c0_i32, %c0_i32_0 : i32, i32
  }
  func.func @transform_4(%arg0: i32) -> (i32, i32, i32) {
    %c0_i32 = arith.constant 0 : i32
    %c0_i32_0 = arith.constant 0 : i32
    %c0_i32_1 = arith.constant 0 : i32
    return %arg0, %c0_i32, %c0_i32_0 : i32, i32, i32
  }
}

module attributes {stable_mosaic.version = 11 : i64} {
  func.func @_transformer_kernel(%arg0: i32, %arg1: i32, %arg2: memref<1x8x128xf32, #tpu.memory_space<vmem>>, %arg3: memref<128x128xbf16, #tpu.memory_space<vmem>>, %arg4: memref<1x128xf32, #tpu.memory_space<vmem>>, %arg5: memref<9x128xf32, #tpu.memory_space<vmem>>, %arg6: memref<1x128x384xbf16, #tpu.memory_space<vmem>>, %arg7: memref<1x1x384xf32, #tpu.memory_space<vmem>>, %arg8: memref<1x128x128xbf16, #tpu.memory_space<vmem>>, %arg9: memref<1x1x128xf32, #tpu.memory_space<vmem>>, %arg10: memref<1x1x128xf32, #tpu.memory_space<vmem>>, %arg11: memref<1x1x128xf32, #tpu.memory_space<vmem>>, %arg12: memref<1x128x256xbf16, #tpu.memory_space<vmem>>, %arg13: memref<1x1x256xf32, #tpu.memory_space<vmem>>, %arg14: memref<1x256x128xbf16, #tpu.memory_space<vmem>>, %arg15: memref<1x1x128xf32, #tpu.memory_space<vmem>>, %arg16: memref<1x1x128xf32, #tpu.memory_space<vmem>>, %arg17: memref<1x1x128xf32, #tpu.memory_space<vmem>>, %arg18: memref<1x128xf32, #tpu.memory_space<vmem>>, %arg19: memref<1x128xf32, #tpu.memory_space<vmem>>, %arg20: memref<128x128xbf16, #tpu.memory_space<vmem>>, %arg21: memref<1x128xf32, #tpu.memory_space<vmem>>, %arg22: memref<1x1x128xf32, #tpu.memory_space<vmem>>, %arg23: memref<9x128xf32, #tpu.memory_space<vmem>>) attributes {dimension_semantics = [#tpu.dimension_semantics<parallel>, #tpu.dimension_semantics<arbitrary>], iteration_bounds = array<i64: 2, 2>, scalar_prefetch = 0 : i64, scratch_operands = 1 : i64, tpu.core_type = #tpu.core_type<tc>, window_params = [{transform_indices = @transform_0, window_bounds = array<i64: 1, 8, 128>}, {pipeline_mode = #tpu.pipeline_mode<synchronous>, transform_indices = @transform_1, window_bounds = array<i64: 128, 128>}, {pipeline_mode = #tpu.pipeline_mode<synchronous>, transform_indices = @transform_2, window_bounds = array<i64: 1, 128>}, {pipeline_mode = #tpu.pipeline_mode<synchronous>, transform_indices = @transform_3, window_bounds = array<i64: 9, 128>}, {transform_indices = @transform_4, window_bounds = array<i64: 1, 128, 384>}, {transform_indices = @transform_5, window_bounds = array<i64: 1, 1, 384>}, {transform_indices = @transform_6, window_bounds = array<i64: 1, 128, 128>}, {transform_indices = @transform_7, window_bounds = array<i64: 1, 1, 128>}, {transform_indices = @transform_8, window_bounds = array<i64: 1, 1, 128>}, {transform_indices = @transform_9, window_bounds = array<i64: 1, 1, 128>}, {transform_indices = @transform_10, window_bounds = array<i64: 1, 128, 256>}, {transform_indices = @transform_11, window_bounds = array<i64: 1, 1, 256>}, {transform_indices = @transform_12, window_bounds = array<i64: 1, 256, 128>}, {transform_indices = @transform_13, window_bounds = array<i64: 1, 1, 128>}, {transform_indices = @transform_14, window_bounds = array<i64: 1, 1, 128>}, {transform_indices = @transform_15, window_bounds = array<i64: 1, 1, 128>}, {pipeline_mode = #tpu.pipeline_mode<synchronous>, transform_indices = @transform_16, window_bounds = array<i64: 1, 128>}, {pipeline_mode = #tpu.pipeline_mode<synchronous>, transform_indices = @transform_17, window_bounds = array<i64: 1, 128>}, {pipeline_mode = #tpu.pipeline_mode<synchronous>, transform_indices = @transform_18, window_bounds = array<i64: 128, 128>}, {pipeline_mode = #tpu.pipeline_mode<synchronous>, transform_indices = @transform_19, window_bounds = array<i64: 1, 128>}, {transform_indices = @transform_20, window_bounds = array<i64: 1, 1, 128>}]} {
    %c0_i32 = arith.constant 0 : i32
    %0 = arith.cmpi eq, %arg1, %c0_i32 : i32
    %1 = arith.extui %0 : i1 to i32
    %c0_i32_0 = arith.constant 0 : i32
    %2 = arith.cmpi ne, %1, %c0_i32_0 : i32
    scf.if %2 {
      %c0_75 = arith.constant 0 : index
      %c0_76 = arith.constant 0 : index
      %c0_77 = arith.constant 0 : index
      %173 = vector.load %arg2[%c0_75, %c0_76, %c0_77] : memref<1x8x128xf32, #tpu.memory_space<vmem>>, vector<1x8x128xf32>
      %174 = vector.shape_cast %173 : vector<1x8x128xf32> to vector<8x128xf32>
      %175 = arith.truncf %174 : vector<8x128xf32> to vector<8x128xbf16>
      %c0_78 = arith.constant 0 : index
      %c0_79 = arith.constant 0 : index
      %176 = vector.load %arg3[%c0_78, %c0_79] : memref<128x128xbf16, #tpu.memory_space<vmem>>, vector<128x128xbf16>
      %cst_80 = arith.constant dense<0.000000e+00> : vector<8x128xf32>
      %177 = tpu.matmul %175, %176, %cst_80 {dimension_numbers = #tpu.dot_dimension_numbers<[1], [0], [0], [1], [0, 0, 1, 1], [], []>} : vector<8x128xbf16>, vector<128x128xbf16>, vector<8x128xf32> -> vector<8x128xf32>
      %c0_81 = arith.constant 0 : index
      %c0_82 = arith.constant 0 : index
      %178 = vector.load %arg4[%c0_81, %c0_82] : memref<1x128xf32, #tpu.memory_space<vmem>>, vector<1x128xf32>
      %179 = vector.broadcast %178 : vector<1x128xf32> to vector<8x128xf32>
      %180 = arith.addf %177, %179 : vector<8x128xf32>
      %cst_83 = arith.constant 0.000000e+00 : f32
      %181 = vector.broadcast %cst_83 : f32 to vector<1x128xf32>
      %182 = tpu.concatenate %181, %180 in 0 : vector<1x128xf32>, vector<8x128xf32> -> vector<9x128xf32>
      %c0_84 = arith.constant 0 : index
      %c0_85 = arith.constant 0 : index
      %183 = vector.load %arg5[%c0_84, %c0_85] : memref<9x128xf32, #tpu.memory_space<vmem>>, vector<9x128xf32>
      %184 = arith.addf %182, %183 : vector<9x128xf32>
      %c0_86 = arith.constant 0 : index
      %c0_87 = arith.constant 0 : index
      %185 = vector.load %arg23[%c0_86, %c0_87] : memref<9x128xf32, #tpu.memory_space<vmem>>, vector<9x128xf32>
      tpu.vector_store %arg23[%c0_86, %c0_87], %184 {strides = array<i32>} : memref<9x128xf32, #tpu.memory_space<vmem>>, vector<9x128xf32>,
    } else {
    }
    %c0 = arith.constant 0 : index
    %c0_1 = arith.constant 0 : index
    %3 = vector.load %arg23[%c0, %c0_1] : memref<9x128xf32, #tpu.memory_space<vmem>>, vector<9x128xf32>
    %4 = arith.truncf %3 : vector<9x128xf32> to vector<9x128xbf16>
    %c0_2 = arith.constant 0 : index
    %c0_3 = arith.constant 0 : index
    %c0_4 = arith.constant 0 : index
    %5 = vector.load %arg6[%c0_2, %c0_3, %c0_4] : memref<1x128x384xbf16, #tpu.memory_space<vmem>>, vector<1x128x384xbf16>
    %6 = vector.shape_cast %5 : vector<1x128x384xbf16> to vector<128x384xbf16>
    %cst = arith.constant dense<0.000000e+00> : vector<9x384xf32>
    %7 = tpu.matmul %4, %6, %cst {dimension_numbers = #tpu.dot_dimension_numbers<[1], [0], [0], [1], [0, 0, 1, 1], [], []>} : vector<9x128xbf16>, vector<128x384xbf16>, vector<9x384xf32> -> vector<9x384xf32>
    %c0_5 = arith.constant 0 : index
    %c0_6 = arith.constant 0 : index
    %c0_7 = arith.constant 0 : index
    %8 = vector.load %arg7[%c0_5, %c0_6, %c0_7] : memref<1x1x384xf32, #tpu.memory_space<vmem>>, vector<1x1x384xf32>
    %9 = vector.shape_cast %8 : vector<1x1x384xf32> to vector<1x384xf32>
    %10 = vector.broadcast %9 : vector<1x384xf32> to vector<9x384xf32>
    %11 = arith.addf %7, %10 : vector<9x384xf32>
    %12 = vector.extract_strided_slice %11 {offsets = [0, 0], sizes = [9, 128], strides = [1, 1]} : vector<9x384xf32> to vector<9x128xf32>
    %cst_8 = arith.constant 0.176776692 : f32
    %13 = vector.broadcast %cst_8 : f32 to vector<9x128xf32>
    %14 = arith.mulf %12, %13 : vector<9x128xf32>
    %15 = vector.extract_strided_slice %11 {offsets = [0, 128], sizes = [9, 128], strides = [1, 1]} : vector<9x384xf32> to vector<9x128xf32>
    %16 = vector.extract_strided_slice %11 {offsets = [0, 256], sizes = [9, 128], strides = [1, 1]} : vector<9x384xf32> to vector<9x128xf32>
    %17 = vector.extract_strided_slice %14 {offsets = [0, 0], sizes = [9, 32], strides = [1, 1]} : vector<9x128xf32> to vector<9x32xf32>
    %18 = vector.extract_strided_slice %15 {offsets = [0, 0], sizes = [9, 32], strides = [1, 1]} : vector<9x128xf32> to vector<9x32xf32>
    %cst_9 = arith.constant dense<0.000000e+00> : vector<9x9xf32>
    %19 = tpu.matmul %17, %18, %cst_9 {dimension_numbers = #tpu.dot_dimension_numbers<[1], [1], [0], [0], [0, 0, 1, 0], [], []>} : vector<9x32xf32>, vector<9x32xf32>, vector<9x9xf32> -> vector<9x9xf32>
    %cst_10 = arith.constant dense<0xFF800000> : vector<9xf32>
    %20 = vector.multi_reduction <maximumf>, %19, %cst_10 [1] : vector<9x9xf32> to vector<9xf32>
    %21 = vector.shape_cast %20 : vector<9xf32> to vector<9x1xf32>
    %22 = vector.broadcast %21 : vector<9x1xf32> to vector<9x9xf32>
    %23 = arith.subf %19, %22 : vector<9x9xf32>
    %24 = math.exp %23 : vector<9x9xf32>
    %cst_11 = arith.constant dense<0.000000e+00> : vector<9xf32>
    %25 = vector.multi_reduction <add>, %24, %cst_11 [1] : vector<9x9xf32> to vector<9xf32>
    %26 = vector.shape_cast %25 : vector<9xf32> to vector<9x1xf32>
    %27 = tpu.reciprocal %26 {approx = true} : vector<9x1xf32> -> vector<9x1xf32>
    %28 = vector.broadcast %27 : vector<9x1xf32> to vector<9x9xf32>
    %29 = arith.mulf %24, %28 : vector<9x9xf32>
    %30 = vector.extract_strided_slice %16 {offsets = [0, 0], sizes = [9, 32], strides = [1, 1]} : vector<9x128xf32> to vector<9x32xf32>
    %cst_12 = arith.constant dense<0.000000e+00> : vector<9x32xf32>
    %31 = tpu.matmul %29, %30, %cst_12 {dimension_numbers = #tpu.dot_dimension_numbers<[1], [0], [0], [1], [0, 0, 1, 1], [], []>} : vector<9x9xf32>, vector<9x32xf32>, vector<9x32xf32> -> vector<9x32xf32>
    %32 = vector.extract_strided_slice %14 {offsets = [0, 32], sizes = [9, 32], strides = [1, 1]} : vector<9x128xf32> to vector<9x32xf32>
    %33 = vector.extract_strided_slice %15 {offsets = [0, 32], sizes = [9, 32], strides = [1, 1]} : vector<9x128xf32> to vector<9x32xf32>
    %cst_13 = arith.constant dense<0.000000e+00> : vector<9x9xf32>
    %34 = tpu.matmul %32, %33, %cst_13 {dimension_numbers = #tpu.dot_dimension_numbers<[1], [1], [0], [0], [0, 0, 1, 0], [], []>} : vector<9x32xf32>, vector<9x32xf32>, vector<9x9xf32> -> vector<9x9xf32>
    %cst_14 = arith.constant dense<0xFF800000> : vector<9xf32>
    %35 = vector.multi_reduction <maximumf>, %34, %cst_14 [1] : vector<9x9xf32> to vector<9xf32>
    %36 = vector.shape_cast %35 : vector<9xf32> to vector<9x1xf32>
    %37 = vector.broadcast %36 : vector<9x1xf32> to vector<9x9xf32>
    %38 = arith.subf %34, %37 : vector<9x9xf32>
    %39 = math.exp %38 : vector<9x9xf32>
    %cst_15 = arith.constant dense<0.000000e+00> : vector<9xf32>
    %40 = vector.multi_reduction <add>, %39, %cst_15 [1] : vector<9x9xf32> to vector<9xf32>
    %41 = vector.shape_cast %40 : vector<9xf32> to vector<9x1xf32>
    %42 = tpu.reciprocal %41 {approx = true} : vector<9x1xf32> -> vector<9x1xf32>
    %43 = vector.broadcast %42 : vector<9x1xf32> to vector<9x9xf32>
    %44 = arith.mulf %39, %43 : vector<9x9xf32>
    %45 = vector.extract_strided_slice %16 {offsets = [0, 32], sizes = [9, 32], strides = [1, 1]} : vector<9x128xf32> to vector<9x32xf32>
    %cst_16 = arith.constant dense<0.000000e+00> : vector<9x32xf32>
    %46 = tpu.matmul %44, %45, %cst_16 {dimension_numbers = #tpu.dot_dimension_numbers<[1], [0], [0], [1], [0, 0, 1, 1], [], []>} : vector<9x9xf32>, vector<9x32xf32>, vector<9x32xf32> -> vector<9x32xf32>
    %47 = vector.extract_strided_slice %14 {offsets = [0, 64], sizes = [9, 32], strides = [1, 1]} : vector<9x128xf32> to vector<9x32xf32>
    %48 = vector.extract_strided_slice %15 {offsets = [0, 64], sizes = [9, 32], strides = [1, 1]} : vector<9x128xf32> to vector<9x32xf32>
    %cst_17 = arith.constant dense<0.000000e+00> : vector<9x9xf32>
    %49 = tpu.matmul %47, %48, %cst_17 {dimension_numbers = #tpu.dot_dimension_numbers<[1], [1], [0], [0], [0, 0, 1, 0], [], []>} : vector<9x32xf32>, vector<9x32xf32>, vector<9x9xf32> -> vector<9x9xf32>
    %cst_18 = arith.constant dense<0xFF800000> : vector<9xf32>
    %50 = vector.multi_reduction <maximumf>, %49, %cst_18 [1] : vector<9x9xf32> to vector<9xf32>
    %51 = vector.shape_cast %50 : vector<9xf32> to vector<9x1xf32>
    %52 = vector.broadcast %51 : vector<9x1xf32> to vector<9x9xf32>
    %53 = arith.subf %49, %52 : vector<9x9xf32>
    %54 = math.exp %53 : vector<9x9xf32>
    %cst_19 = arith.constant dense<0.000000e+00> : vector<9xf32>
    %55 = vector.multi_reduction <add>, %54, %cst_19 [1] : vector<9x9xf32> to vector<9xf32>
    %56 = vector.shape_cast %55 : vector<9xf32> to vector<9x1xf32>
    %57 = tpu.reciprocal %56 {approx = true} : vector<9x1xf32> -> vector<9x1xf32>
    %58 = vector.broadcast %57 : vector<9x1xf32> to vector<9x9xf32>
    %59 = arith.mulf %54, %58 : vector<9x9xf32>
    %60 = vector.extract_strided_slice %16 {offsets = [0, 64], sizes = [9, 32], strides = [1, 1]} : vector<9x128xf32> to vector<9x32xf32>
    %cst_20 = arith.constant dense<0.000000e+00> : vector<9x32xf32>
    %61 = tpu.matmul %59, %60, %cst_20 {dimension_numbers = #tpu.dot_dimension_numbers<[1], [0], [0], [1], [0, 0, 1, 1], [], []>} : vector<9x9xf32>, vector<9x32xf32>, vector<9x32xf32> -> vector<9x32xf32>
    %62 = vector.extract_strided_slice %14 {offsets = [0, 96], sizes = [9, 32], strides = [1, 1]} : vector<9x128xf32> to vector<9x32xf32>
    %63 = vector.extract_strided_slice %15 {offsets = [0, 96], sizes = [9, 32], strides = [1, 1]} : vector<9x128xf32> to vector<9x32xf32>
    %cst_21 = arith.constant dense<0.000000e+00> : vector<9x9xf32>
    %64 = tpu.matmul %62, %63, %cst_21 {dimension_numbers = #tpu.dot_dimension_numbers<[1], [1], [0], [0], [0, 0, 1, 0], [], []>} : vector<9x32xf32>, vector<9x32xf32>, vector<9x9xf32> -> vector<9x9xf32>
    %cst_22 = arith.constant dense<0xFF800000> : vector<9xf32>
    %65 = vector.multi_reduction <maximumf>, %64, %cst_22 [1] : vector<9x9xf32> to vector<9xf32>
    %66 = vector.shape_cast %65 : vector<9xf32> to vector<9x1xf32>
    %67 = vector.broadcast %66 : vector<9x1xf32> to vector<9x9xf32>
    %68 = arith.subf %64, %67 : vector<9x9xf32>
    %69 = math.exp %68 : vector<9x9xf32>
    %cst_23 = arith.constant dense<0.000000e+00> : vector<9xf32>
    %70 = vector.multi_reduction <add>, %69, %cst_23 [1] : vector<9x9xf32> to vector<9xf32>
    %71 = vector.shape_cast %70 : vector<9xf32> to vector<9x1xf32>
    %72 = tpu.reciprocal %71 {approx = true} : vector<9x1xf32> -> vector<9x1xf32>
    %73 = vector.broadcast %72 : vector<9x1xf32> to vector<9x9xf32>
    %74 = arith.mulf %69, %73 : vector<9x9xf32>
    %75 = vector.extract_strided_slice %16 {offsets = [0, 96], sizes = [9, 32], strides = [1, 1]} : vector<9x128xf32> to vector<9x32xf32>
    %cst_24 = arith.constant dense<0.000000e+00> : vector<9x32xf32>
    %76 = tpu.matmul %74, %75, %cst_24 {dimension_numbers = #tpu.dot_dimension_numbers<[1], [0], [0], [1], [0, 0, 1, 1], [], []>} : vector<9x9xf32>, vector<9x32xf32>, vector<9x32xf32> -> vector<9x32xf32>
    %77 = tpu.concatenate %31, %46, %61, %76 in 1 : vector<9x32xf32>, vector<9x32xf32>, vector<9x32xf32>, vector<9x32xf32> -> vector<9x128xf32>
    %78 = arith.truncf %77 : vector<9x128xf32> to vector<9x128xbf16>
    %c0_25 = arith.constant 0 : index
    %c0_26 = arith.constant 0 : index
    %c0_27 = arith.constant 0 : index
    %79 = vector.load %arg8[%c0_25, %c0_26, %c0_27] : memref<1x128x128xbf16, #tpu.memory_space<vmem>>, vector<1x128x128xbf16>
    %80 = vector.shape_cast %79 : vector<1x128x128xbf16> to vector<128x128xbf16>
    %cst_28 = arith.constant dense<0.000000e+00> : vector<9x128xf32>
    %81 = tpu.matmul %78, %80, %cst_28 {dimension_numbers = #tpu.dot_dimension_numbers<[1], [0], [0], [1], [0, 0, 1, 1], [], []>} : vector<9x128xbf16>, vector<128x128xbf16>, vector<9x128xf32> -> vector<9x128xf32>
    %c0_29 = arith.constant 0 : index
    %c0_30 = arith.constant 0 : index
    %c0_31 = arith.constant 0 : index
    %82 = vector.load %arg9[%c0_29, %c0_30, %c0_31] : memref<1x1x128xf32, #tpu.memory_space<vmem>>, vector<1x1x128xf32>
    %83 = vector.shape_cast %82 : vector<1x1x128xf32> to vector<1x128xf32>
    %84 = vector.broadcast %83 : vector<1x128xf32> to vector<9x128xf32>
    %85 = arith.addf %81, %84 : vector<9x128xf32>
    %86 = arith.addf %3, %85 : vector<9x128xf32>
    %cst_32 = arith.constant dense<0.000000e+00> : vector<9xf32>
    %87 = vector.multi_reduction <add>, %86, %cst_32 [1] : vector<9x128xf32> to vector<9xf32>
    %88 = vector.shape_cast %87 : vector<9xf32> to vector<9x1xf32>
    %cst_33 = arith.constant 1.280000e+02 : f32
    %89 = vector.broadcast %cst_33 : f32 to vector<9x1xf32>
    %90 = arith.divf %88, %89 : vector<9x1xf32>
    %91 = vector.broadcast %90 : vector<9x1xf32> to vector<9x128xf32>
    %92 = arith.subf %86, %91 : vector<9x128xf32>
    %93 = arith.mulf %92, %92 : vector<9x128xf32>
    %cst_34 = arith.constant dense<0.000000e+00> : vector<9xf32>
    %94 = vector.multi_reduction <add>, %93, %cst_34 [1] : vector<9x128xf32> to vector<9xf32>
    %95 = vector.shape_cast %94 : vector<9xf32> to vector<9x1xf32>
    %cst_35 = arith.constant 1.280000e+02 : f32
    %96 = vector.broadcast %cst_35 : f32 to vector<9x1xf32>
    %97 = arith.divf %95, %96 : vector<9x1xf32>
    %98 = vector.broadcast %90 : vector<9x1xf32> to vector<9x128xf32>
    %99 = arith.subf %86, %98 : vector<9x128xf32>
    %cst_36 = arith.constant 9.99999974E-6 : f32
    %100 = vector.broadcast %cst_36 : f32 to vector<9x1xf32>
    %101 = arith.addf %97, %100 : vector<9x1xf32>
    %102 = math.rsqrt %101 : vector<9x1xf32>
    %103 = vector.broadcast %102 : vector<9x1xf32> to vector<9x128xf32>
    %104 = arith.mulf %99, %103 : vector<9x128xf32>
    %c0_37 = arith.constant 0 : index
    %c0_38 = arith.constant 0 : index
    %c0_39 = arith.constant 0 : index
    %105 = vector.load %arg10[%c0_37, %c0_38, %c0_39] : memref<1x1x128xf32, #tpu.memory_space<vmem>>, vector<1x1x128xf32>
    %106 = vector.shape_cast %105 : vector<1x1x128xf32> to vector<1x128xf32>
    %107 = vector.broadcast %106 : vector<1x128xf32> to vector<9x128xf32>
    %108 = arith.mulf %104, %107 : vector<9x128xf32>
    %c0_40 = arith.constant 0 : index
    %c0_41 = arith.constant 0 : index
    %c0_42 = arith.constant 0 : index
    %109 = vector.load %arg11[%c0_40, %c0_41, %c0_42] : memref<1x1x128xf32, #tpu.memory_space<vmem>>, vector<1x1x128xf32>
    %110 = vector.shape_cast %109 : vector<1x1x128xf32> to vector<1x128xf32>
    %111 = vector.broadcast %110 : vector<1x128xf32> to vector<9x128xf32>
    %112 = arith.addf %108, %111 : vector<9x128xf32>
    %113 = arith.truncf %112 : vector<9x128xf32> to vector<9x128xbf16>
    %c0_43 = arith.constant 0 : index
    %c0_44 = arith.constant 0 : index
    %c0_45 = arith.constant 0 : index
    %114 = vector.load %arg12[%c0_43, %c0_44, %c0_45] : memref<1x128x256xbf16, #tpu.memory_space<vmem>>, vector<1x128x256xbf16>
    %115 = vector.shape_cast %114 : vector<1x128x256xbf16> to vector<128x256xbf16>
    %cst_46 = arith.constant dense<0.000000e+00> : vector<9x256xf32>
    %116 = tpu.matmul %113, %115, %cst_46 {dimension_numbers = #tpu.dot_dimension_numbers<[1], [0], [0], [1], [0, 0, 1, 1], [], []>} : vector<9x128xbf16>, vector<128x256xbf16>, vector<9x256xf32> -> vector<9x256xf32>
    %c0_47 = arith.constant 0 : index
    %c0_48 = arith.constant 0 : index
    %c0_49 = arith.constant 0 : index
    %117 = vector.load %arg13[%c0_47, %c0_48, %c0_49] : memref<1x1x256xf32, #tpu.memory_space<vmem>>, vector<1x1x256xf32>
    %118 = vector.shape_cast %117 : vector<1x1x256xf32> to vector<1x256xf32>
    %119 = vector.broadcast %118 : vector<1x256xf32> to vector<9x256xf32>
    %120 = arith.addf %116, %119 : vector<9x256xf32>
    %cst_50 = arith.constant 5.000000e-01 : f32
    %121 = vector.broadcast %cst_50 : f32 to vector<9x256xf32>
    %122 = arith.mulf %121, %120 : vector<9x256xf32>
    %cst_51 = arith.constant 4.471500e-02 : f32
    %123 = vector.broadcast %cst_51 : f32 to vector<9x256xf32>
    %124 = arith.mulf %123, %120 : vector<9x256xf32>
    %125 = arith.mulf %124, %120 : vector<9x256xf32>
    %126 = arith.mulf %125, %120 : vector<9x256xf32>
    %127 = arith.addf %120, %126 : vector<9x256xf32>
    %cst_52 = arith.constant 0.797884583 : f32
    %128 = vector.broadcast %cst_52 : f32 to vector<9x256xf32>
    %129 = arith.mulf %128, %127 : vector<9x256xf32>
    %130 = math.tanh %129 : vector<9x256xf32>
    %cst_53 = arith.constant 1.000000e+00 : f32
    %131 = vector.broadcast %cst_53 : f32 to vector<9x256xf32>
    %132 = arith.addf %131, %130 : vector<9x256xf32>
    %133 = arith.mulf %122, %132 : vector<9x256xf32>
    %134 = arith.truncf %133 : vector<9x256xf32> to vector<9x256xbf16>
    %c0_54 = arith.constant 0 : index
    %c0_55 = arith.constant 0 : index
    %c0_56 = arith.constant 0 : index
    %135 = vector.load %arg14[%c0_54, %c0_55, %c0_56] : memref<1x256x128xbf16, #tpu.memory_space<vmem>>, vector<1x256x128xbf16>
    %136 = vector.shape_cast %135 : vector<1x256x128xbf16> to vector<256x128xbf16>
    %cst_57 = arith.constant dense<0.000000e+00> : vector<9x128xf32>
    %137 = tpu.matmul %134, %136, %cst_57 {dimension_numbers = #tpu.dot_dimension_numbers<[1], [0], [0], [1], [0, 0, 1, 1], [], []>} : vector<9x256xbf16>, vector<256x128xbf16>, vector<9x128xf32> -> vector<9x128xf32>
    %c0_58 = arith.constant 0 : index
    %c0_59 = arith.constant 0 : index
    %c0_60 = arith.constant 0 : index
    %138 = vector.load %arg15[%c0_58, %c0_59, %c0_60] : memref<1x1x128xf32, #tpu.memory_space<vmem>>, vector<1x1x128xf32>
    %139 = vector.shape_cast %138 : vector<1x1x128xf32> to vector<1x128xf32>
    %140 = vector.broadcast %139 : vector<1x128xf32> to vector<9x128xf32>
    %141 = arith.addf %137, %140 : vector<9x128xf32>
    %142 = arith.addf %112, %141 : vector<9x128xf32>
    %cst_61 = arith.constant dense<0.000000e+00> : vector<9xf32>
    %143 = vector.multi_reduction <add>, %142, %cst_61 [1] : vector<9x128xf32> to vector<9xf32>
    %144 = vector.shape_cast %143 : vector<9xf32> to vector<9x1xf32>
    %cst_62 = arith.constant 1.280000e+02 : f32
    %145 = vector.broadcast %cst_62 : f32 to vector<9x1xf32>
    %146 = arith.divf %144, %145 : vector<9x1xf32>
    %147 = vector.broadcast %146 : vector<9x1xf32> to vector<9x128xf32>
    %148 = arith.subf %142, %147 : vector<9x128xf32>
    %149 = arith.mulf %148, %148 : vector<9x128xf32>
    %cst_63 = arith.constant dense<0.000000e+00> : vector<9xf32>
    %150 = vector.multi_reduction <add>, %149, %cst_63 [1] : vector<9x128xf32> to vector<9xf32>
    %151 = vector.shape_cast %150 : vector<9xf32> to vector<9x1xf32>
    %cst_64 = arith.constant 1.280000e+02 : f32
    %152 = vector.broadcast %cst_64 : f32 to vector<9x1xf32>
    %153 = arith.divf %151, %152 : vector<9x1xf32>
    %154 = vector.broadcast %146 : vector<9x1xf32> to vector<9x128xf32>
    %155 = arith.subf %142, %154 : vector<9x128xf32>
    %cst_65 = arith.constant 9.99999974E-6 : f32
    %156 = vector.broadcast %cst_65 : f32 to vector<9x1xf32>
    %157 = arith.addf %153, %156 : vector<9x1xf32>
    %158 = math.rsqrt %157 : vector<9x1xf32>
    %159 = vector.broadcast %158 : vector<9x1xf32> to vector<9x128xf32>
    %160 = arith.mulf %155, %159 : vector<9x128xf32>
    %c0_66 = arith.constant 0 : index
    %c0_67 = arith.constant 0 : index
    %c0_68 = arith.constant 0 : index
    %161 = vector.load %arg16[%c0_66, %c0_67, %c0_68] : memref<1x1x128xf32, #tpu.memory_space<vmem>>, vector<1x1x128xf32>
    %162 = vector.shape_cast %161 : vector<1x1x128xf32> to vector<1x128xf32>
    %163 = vector.broadcast %162 : vector<1x128xf32> to vector<9x128xf32>
    %164 = arith.mulf %160, %163 : vector<9x128xf32>
    %c0_69 = arith.constant 0 : index
    %c0_70 = arith.constant 0 : index
    %c0_71 = arith.constant 0 : index
    %165 = vector.load %arg17[%c0_69, %c0_70, %c0_71] : memref<1x1x128xf32, #tpu.memory_space<vmem>>, vector<1x1x128xf32>
    %166 = vector.shape_cast %165 : vector<1x1x128xf32> to vector<1x128xf32>
    %167 = vector.broadcast %166 : vector<1x128xf32> to vector<9x128xf32>
    %168 = arith.addf %164, %167 : vector<9x128xf32>
    %c0_72 = arith.constant 0 : index
    %c0_73 = arith.constant 0 : index
    %169 = vector.load %arg23[%c0_72, %c0_73] : memref<9x128xf32, #tpu.memory_space<vmem>>, vector<9x128xf32>
    tpu.vector_store %arg23[%c0_72, %c0_73], %168 {strides = array<i32>} : memref<9x128xf32, #tpu.memory_space<vmem>>, vector<9x128xf32>,
    %c1_i32 = arith.constant 1 : i32
    %170 = arith.cmpi eq, %arg1, %c1_i32 : i32
    %171 = arith.extui %170 : i1 to i32
    %c0_i32_74 = arith.constant 0 : i32
    %172 = arith.cmpi ne, %171, %c0_i32_74 : i32
    scf.if %172 {
      %173 = vector.extract_strided_slice %168 {offsets = [0, 0], sizes = [1, 128], strides = [1, 1]} : vector<9x128xf32> to vector<1x128xf32>
      %cst_75 = arith.constant dense<0.000000e+00> : vector<1xf32>
      %174 = vector.multi_reduction <add>, %173, %cst_75 [1] : vector<1x128xf32> to vector<1xf32>
      %175 = vector.shape_cast %174 : vector<1xf32> to vector<1x1xf32>
      %cst_76 = arith.constant 1.280000e+02 : f32
      %176 = vector.broadcast %cst_76 : f32 to vector<1x1xf32>
      %177 = arith.divf %175, %176 : vector<1x1xf32>
      %178 = vector.broadcast %177 : vector<1x1xf32> to vector<1x128xf32>
      %179 = arith.subf %173, %178 : vector<1x128xf32>
      %180 = arith.mulf %179, %179 : vector<1x128xf32>
      %cst_77 = arith.constant dense<0.000000e+00> : vector<1xf32>
      %181 = vector.multi_reduction <add>, %180, %cst_77 [1] : vector<1x128xf32> to vector<1xf32>
      %182 = vector.shape_cast %181 : vector<1xf32> to vector<1x1xf32>
      %cst_78 = arith.constant 1.280000e+02 : f32
      %183 = vector.broadcast %cst_78 : f32 to vector<1x1xf32>
      %184 = arith.divf %182, %183 : vector<1x1xf32>
      %185 = vector.broadcast %177 : vector<1x1xf32> to vector<1x128xf32>
      %186 = arith.subf %173, %185 : vector<1x128xf32>
      %cst_79 = arith.constant 9.99999974E-6 : f32
      %187 = vector.broadcast %cst_79 : f32 to vector<1x1xf32>
      %188 = arith.addf %184, %187 : vector<1x1xf32>
      %189 = math.rsqrt %188 : vector<1x1xf32>
      %190 = vector.broadcast %189 : vector<1x1xf32> to vector<1x128xf32>
      %191 = arith.mulf %186, %190 : vector<1x128xf32>
      %c0_80 = arith.constant 0 : index
      %c0_81 = arith.constant 0 : index
      %192 = vector.load %arg18[%c0_80, %c0_81] : memref<1x128xf32, #tpu.memory_space<vmem>>, vector<1x128xf32>
      %193 = arith.mulf %191, %192 : vector<1x128xf32>
      %c0_82 = arith.constant 0 : index
      %c0_83 = arith.constant 0 : index
      %194 = vector.load %arg19[%c0_82, %c0_83] : memref<1x128xf32, #tpu.memory_space<vmem>>, vector<1x128xf32>
      %195 = arith.addf %193, %194 : vector<1x128xf32>
      %196 = arith.truncf %195 : vector<1x128xf32> to vector<1x128xbf16>
      %c0_84 = arith.constant 0 : index
      %c0_85 = arith.constant 0 : index
      %197 = vector.load %arg20[%c0_84, %c0_85] : memref<128x128xbf16, #tpu.memory_space<vmem>>, vector<128x128xbf16>
      %cst_86 = arith.constant dense<0.000000e+00> : vector<1x128xf32>
      %198 = tpu.matmul %196, %197, %cst_86 {dimension_numbers = #tpu.dot_dimension_numbers<[1], [0], [0], [1], [0, 0, 1, 1], [], []>} : vector<1x128xbf16>, vector<128x128xbf16>, vector<1x128xf32> -> vector<1x128xf32>
      %c0_87 = arith.constant 0 : index
      %c0_88 = arith.constant 0 : index
      %199 = vector.load %arg21[%c0_87, %c0_88] : memref<1x128xf32, #tpu.memory_space<vmem>>, vector<1x128xf32>
      %200 = arith.addf %198, %199 : vector<1x128xf32>
      %c0_89 = arith.constant 0 : index
      %c0_90 = arith.constant 0 : index
      %c0_91 = arith.constant 0 : index
      %201 = vector.load %arg22[%c0_89, %c0_90, %c0_91] : memref<1x1x128xf32, #tpu.memory_space<vmem>>, vector<1x1x128xf32>
      %202 = vector.shape_cast %201 : vector<1x1x128xf32> to vector<1x128xf32>
      %203 = vector.shape_cast %200 : vector<1x128xf32> to vector<1x1x128xf32>
      tpu.vector_store %arg22[%c0_89, %c0_90, %c0_91], %203 {strides = array<i32>} : memref<1x1x128xf32, #tpu.memory_space<vmem>>, vector<1x1x128xf32>,
    } else {
    }
    return
  }
  func.func @transform_0(%arg0: i32, %arg1: i32) -> (i32, i32, i32) {
    %c0_i32 = arith.constant 0 : i32
    %c0_i32_0 = arith.constant 0 : i32
    %c0_i32_1 = arith.constant 0 : i32
    return %arg0, %c0_i32, %c0_i32_0 : i32, i32, i32
  }
  func.func @transform_1(%arg0: i32, %arg1: i32) -> (i32, i32) {
    %c0_i32 = arith.constant 0 : i32
    %c0_i32_0 = arith.constant 0 : i32
    %c0_i32_1 = arith.constant 0 : i32
    return %c0_i32, %c0_i32_0 : i32, i32
  }
  func.func @transform_2(%arg0: i32, %arg1: i32) -> (i32, i32) {
    %c0_i32 = arith.constant 0 : i32
    %c0_i32_0 = arith.constant 0 : i32
    %c0_i32_1 = arith.constant 0 : i32
    return %c0_i32, %c0_i32_0 : i32, i32
  }
  func.func @transform_3(%arg0: i32, %arg1: i32) -> (i32, i32) {
    %c0_i32 = arith.constant 0 : i32
    %c0_i32_0 = arith.constant 0 : i32
    %c0_i32_1 = arith.constant 0 : i32
    return %c0_i32, %c0_i32_0 : i32, i32
  }
  func.func @transform_4(%arg0: i32, %arg1: i32) -> (i32, i32, i32) {
    %c0_i32 = arith.constant 0 : i32
    %c0_i32_0 = arith.constant 0 : i32
    %c0_i32_1 = arith.constant 0 : i32
    return %arg1, %c0_i32, %c0_i32_0 : i32, i32, i32
  }
  func.func @transform_5(%arg0: i32, %arg1: i32) -> (i32, i32, i32) {
    %c0_i32 = arith.constant 0 : i32
    %c0_i32_0 = arith.constant 0 : i32
    %c0_i32_1 = arith.constant 0 : i32
    return %arg1, %c0_i32, %c0_i32_0 : i32, i32, i32
  }
  func.func @transform_6(%arg0: i32, %arg1: i32) -> (i32, i32, i32) {
    %c0_i32 = arith.constant 0 : i32
    %c0_i32_0 = arith.constant 0 : i32
    %c0_i32_1 = arith.constant 0 : i32
    return %arg1, %c0_i32, %c0_i32_0 : i32, i32, i32
  }
  func.func @transform_7(%arg0: i32, %arg1: i32) -> (i32, i32, i32) {
    %c0_i32 = arith.constant 0 : i32
    %c0_i32_0 = arith.constant 0 : i32
    %c0_i32_1 = arith.constant 0 : i32
    return %arg1, %c0_i32, %c0_i32_0 : i32, i32, i32
  }
  func.func @transform_8(%arg0: i32, %arg1: i32) -> (i32, i32, i32) {
    %c0_i32 = arith.constant 0 : i32
    %c0_i32_0 = arith.constant 0 : i32
    %c0_i32_1 = arith.constant 0 : i32
    return %arg1, %c0_i32, %c0_i32_0 : i32, i32, i32
  }
  func.func @transform_9(%arg0: i32, %arg1: i32) -> (i32, i32, i32) {
    %c0_i32 = arith.constant 0 : i32
    %c0_i32_0 = arith.constant 0 : i32
    %c0_i32_1 = arith.constant 0 : i32
    return %arg1, %c0_i32, %c0_i32_0 : i32, i32, i32
  }
  func.func @transform_10(%arg0: i32, %arg1: i32) -> (i32, i32, i32) {
    %c0_i32 = arith.constant 0 : i32
    %c0_i32_0 = arith.constant 0 : i32
    %c0_i32_1 = arith.constant 0 : i32
    return %arg1, %c0_i32, %c0_i32_0 : i32, i32, i32
  }
  func.func @transform_11(%arg0: i32, %arg1: i32) -> (i32, i32, i32) {
    %c0_i32 = arith.constant 0 : i32
    %c0_i32_0 = arith.constant 0 : i32
    %c0_i32_1 = arith.constant 0 : i32
    return %arg1, %c0_i32, %c0_i32_0 : i32, i32, i32
  }
  func.func @transform_12(%arg0: i32, %arg1: i32) -> (i32, i32, i32) {
    %c0_i32 = arith.constant 0 : i32
    %c0_i32_0 = arith.constant 0 : i32
    %c0_i32_1 = arith.constant 0 : i32
    return %arg1, %c0_i32, %c0_i32_0 : i32, i32, i32
  }
  func.func @transform_13(%arg0: i32, %arg1: i32) -> (i32, i32, i32) {
    %c0_i32 = arith.constant 0 : i32
    %c0_i32_0 = arith.constant 0 : i32
    %c0_i32_1 = arith.constant 0 : i32
    return %arg1, %c0_i32, %c0_i32_0 : i32, i32, i32
  }
  func.func @transform_14(%arg0: i32, %arg1: i32) -> (i32, i32, i32) {
    %c0_i32 = arith.constant 0 : i32
    %c0_i32_0 = arith.constant 0 : i32
    %c0_i32_1 = arith.constant 0 : i32
    return %arg1, %c0_i32, %c0_i32_0 : i32, i32, i32
  }
  func.func @transform_15(%arg0: i32, %arg1: i32) -> (i32, i32, i32) {
    %c0_i32 = arith.constant 0 : i32
    %c0_i32_0 = arith.constant 0 : i32
    %c0_i32_1 = arith.constant 0 : i32
    return %arg1, %c0_i32, %c0_i32_0 : i32, i32, i32
  }
  func.func @transform_16(%arg0: i32, %arg1: i32) -> (i32, i32) {
    %c0_i32 = arith.constant 0 : i32
    %c0_i32_0 = arith.constant 0 : i32
    %c0_i32_1 = arith.constant 0 : i32
    return %c0_i32, %c0_i32_0 : i32, i32
  }
  func.func @transform_17(%arg0: i32, %arg1: i32) -> (i32, i32) {
    %c0_i32 = arith.constant 0 : i32
    %c0_i32_0 = arith.constant 0 : i32
    %c0_i32_1 = arith.constant 0 : i32
    return %c0_i32, %c0_i32_0 : i32, i32
  }
  func.func @transform_18(%arg0: i32, %arg1: i32) -> (i32, i32) {
    %c0_i32 = arith.constant 0 : i32
    %c0_i32_0 = arith.constant 0 : i32
    %c0_i32_1 = arith.constant 0 : i32
    return %c0_i32, %c0_i32_0 : i32, i32
  }
  func.func @transform_19(%arg0: i32, %arg1: i32) -> (i32, i32) {
    %c0_i32 = arith.constant 0 : i32
    %c0_i32_0 = arith.constant 0 : i32
    %c0_i32_1 = arith.constant 0 : i32
    return %c0_i32, %c0_i32_0 : i32, i32
  }
  func.func @transform_20(%arg0: i32, %arg1: i32) -> (i32, i32, i32) {
    %c0_i32 = arith.constant 0 : i32
    %c0_i32_0 = arith.constant 0 : i32
    %c0_i32_1 = arith.constant 0 : i32
    return %arg0, %c0_i32, %c0_i32_0 : i32, i32, i32
  }
}

</mosaic_0001>

<bundles_post_ra>
// kernel: forward.2
= control target key start
LH: loop header
LB: loop body
LE: loop exit
PB: predicated region body
PF: predicated region fallthrough
CT: control target
= control target key end

     0   :  { %9 = vsyncpa [#allocation3], 0  ;;  %s1294_s15 = smov 0   ;;  %s1408_s0 = inlined_call_operand.vmem [shape: f32[2,13,128], index: 0, kind: input, shape index: {}]   ;;  %s1409_s1 = inlined_call_operand.vmem [shape: f32[1,256], index: 1, kind: input, shape index: {}]   ;;  %s1410_s2 = inlined_call_operand.hbm [shape: bf16[256,512], index: 2, kind: input, shape index: {}]   ;;  %s1411_s3 = inlined_call_operand.vmem [shape: bf16[256,128], index: 3, kind: input, shape index: {}]   ;;  %s1412_s4 = inlined_call_operand.vmem [shape: f32[2,12,128], index: 4, kind: output, shape index: {}]  }
   0x1 LB: > { %s1300_s16 = sadd.s32 4294967295, %s1264_s15   ;;  %p974_p0 = scmp.ge.s32.totalorder %s1264_s15, 1  ;;  %s1264_s15 = sphi %s1294_s15, %s15_s15  }
   0x2   : > { %p135_p1 = scmp.lt.s32.totalorder %s1264_s15, 3  ;;  %s1266_s17 = smov [#allocation2]  }
   0x3   : > { %s150_s18 = sshll.u32 %s1266_s17, 4  ;;  %p1413_p3 = scmp.eq.s32.totalorder %s1300_s16, 0  ;;  %s151_s18 = int_to_ptr.vmem [resolvable:$true] %s150_s18 }
   0x4   : > { %p1304_p2 = pnand %p974_p0, %p135_p1  ;;  %s1226_s23 = scalar_lea.hbm %s1410_s2, 8192 }
   0x5   : > { %p1227_p6 = scmp.ne.s32.totalorder %s1410_s2, %s1226_s23  ;;  %p1233_p10 = scmp.lt.u32.totalorder %s1226_s23, %s1410_s2 }
   0x6   : > { %s1415_s19 = scalar_select %p1304_p2, 1, 0 }
   0x7   : > { %p1093_p4 = pneg %p1304_p2 }
   0x9   : > { %p1313_p5 = pnand %p1413_p3, %p1093_p4 }
   0xb   : > { %p1228_p7 = pneg %p1313_p5 }
   0xd   : > { %p1229_p8 = pnand %p1228_p7, %p1227_p6 }
   0xf   : > { %p1230_p9 = pneg %p1229_p8 }
  0x11   : > { %p1235_p11 = pnand %p1233_p10, %p1230_p9 }
  0x13   : > { %1238 = shalt.err (!%p1235_p11)
}
  0x14   : > { %s1239_s28 = scalar_lea.vmem %s151_s18, 8192  ;;  %p1247_p1 = scmp.lt.s32.totalorder %s151_s18, %s151_s18 }
  0x15   : > { %p1240_p12 = scmp.ne.s32.totalorder %s151_s18, %s1239_s28  ;;  %p1248_p4 = scmp.lt.s32.totalorder %s1239_s28, %s1239_s28 }
  0x17   : > { %p1242_p13 = pnand %p1240_p12, %p1228_p7  ;;  %p1249_p3 = por %p1248_p4, %p1247_p1 }
  0x19   : > { %p1243_p0 = pneg %p1242_p13 }
  0x1b   : > { %p1250_p2 = pnand %p1249_p3, %p1243_p0 }
  0x1d   : > { %1253 = shalt.err (!%p1250_p2)
}
  0x1e   : > { %s1267_s29 = smov 256   ;;  %s1268_s30 = smov 16  }
  0x1f   : > { %1096 = dma.hbm_to_vmem [thread:$0]  (!%p1313_p5), %s1410_s2, 8192, %s151_s18, [#allocation3], %s1267_s29, %s1267_s29, %s1268_s30  }
  0x20   : > { %p1417_p6 = scmp.ne.s32.totalorder %s1415_s19, 0 }
  0x21   : > { %p1418_p8 = scmp.eq.s32.totalorder (!%p1417_p6), %s1300_s16, 0 }
  0x22   : > { %177 = sbr.rel (%p1417_p6) target bundleno = 564 (0x234), region = 36 }
  0x29   : > { %1259 = dma.done.wait (%p1418_p8), [#allocation3], 8192   ;;  %p1419_p7 = pmov %p1418_p8 }
  0x2a   : > { %v1110_v0 = vld [vmem:[#allocation2 + $0x4] ss:$16 sps:$4 sm:$0xff]   ;;  %v1112_v1 = vld [vmem:[#allocation2 + $0xc] ss:$16 sps:$4 sm:$0xff]   ;;  %v1114_v2 = vld [vmem:[#allocation2] ss:$16 sps:$4 sm:$0xff]   ;;  %v226_v36 = vlaneseq }
  0x2b   : > { %1261 = vsyncadd (%p1419_p7), [#allocation3], 4294959104  ;;  %626 = vmatprep.subr.bf16.mxu0 %v1110_v0  ;;  %v1115_v3 = vld [vmem:[#allocation2 + $0x8] ss:$16 sps:$4 sm:$0xff]   ;;  %669 = vmatprep.subr.bf16.mxu1 %v1112_v1  ;;  %v1116_v4 = vld [vmem:[#allocation2 + $0x24] ss:$16 sps:$4 sm:$0xff]  }
  0x2c   : > { %627 = vmatpush1.bf16.msra.mxu0 %v1114_v2  ;;  %670 = vmatpush1.bf16.msra.mxu1 %v1115_v3  ;;  %v1118_v5 = vld [vmem:[#allocation2 + $0x2c] ss:$16 sps:$4 sm:$0xff]   ;;  %v1120_v6 = vld [vmem:[#allocation2 + $0x20] ss:$16 sps:$4 sm:$0xff]   ;;  %v1121_v7 = vld [vmem:[#allocation2 + $0x28] ss:$16 sps:$4 sm:$0xff]  }
  0x2d   : > { %628 = vmatprep.subr.bf16.mxu0 %v1116_v4  ;;  %671 = vmatprep.subr.bf16.mxu1 %v1118_v5  ;;  %v1122_v8 = vld [vmem:[#allocation2 + $0x44] ss:$16 sps:$4 sm:$0xff]   ;;  %v1124_v9 = vld [vmem:[#allocation2 + $0x4c] ss:$16 sps:$4 sm:$0xff]   ;;  %v1126_v10 = vld [vmem:[#allocation2 + $0x40] ss:$16 sps:$4 sm:$0xff]  }
  0x2e   : > { %v1127_v11 = vld [vmem:[#allocation2 + $0x48] ss:$16 sps:$4 sm:$0xff]   ;;  %v1128_v12 = vld [vmem:[#allocation2 + $0x64] ss:$16 sps:$4 sm:$0xff]   ;;  %v1130_v13 = vld [vmem:[#allocation2 + $0x6c] ss:$16 sps:$4 sm:$0xff]  }
  0x2f   : > { %v1132_v14 = vld [vmem:[#allocation2 + $0x60] ss:$16 sps:$4 sm:$0xff]   ;;  %v1133_v15 = vld [vmem:[#allocation2 + $0x68] ss:$16 sps:$4 sm:$0xff]   ;;  %v1134_v16 = vld [vmem:[#allocation2 + $0x84] ss:$16 sps:$4 sm:$0xff]  }
  0x30   : > { %629 = vmatpush1.bf16.msra.mxu0 %v1120_v6  ;;  %672 = vmatpush1.bf16.msra.mxu1 %v1121_v7  ;;  %v1136_v17 = vld [vmem:[#allocation2 + $0x8c] ss:$16 sps:$4 sm:$0xff]   ;;  %v1138_v18 = vld [vmem:[#allocation2 + $0x80] ss:$16 sps:$4 sm:$0xff]   ;;  %v1139_v19 = vld [vmem:[#allocation2 + $0x88] ss:$16 sps:$4 sm:$0xff]  }
  0x31   : > { %630 = vmatprep.subr.bf16.mxu0 %v1122_v8  ;;  %673 = vmatprep.subr.bf16.mxu1 %v1124_v9  ;;  %v1140_v20 = vld [vmem:[#allocation2 + $0xa4] ss:$16 sps:$4 sm:$0xff]   ;;  %v1142_v21 = vld [vmem:[#allocation2 + $0xac] ss:$16 sps:$4 sm:$0xff]   ;;  %v1144_v22 = vld [vmem:[#allocation2 + $0xa0] ss:$16 sps:$4 sm:$0xff]  }
  0x32   : > { %v1145_v23 = vld [vmem:[#allocation2 + $0xa8] ss:$16 sps:$4 sm:$0xff]   ;;  %v1146_v24 = vld [vmem:[#allocation2 + $0xc4] ss:$16 sps:$4 sm:$0xff]   ;;  %v1148_v25 = vld [vmem:[#allocation2 + $0xcc] ss:$16 sps:$4 sm:$0xff]  }
  0x33   : > { %v1150_v26 = vld [vmem:[#allocation2 + $0xc0] ss:$16 sps:$4 sm:$0xff]   ;;  %v1151_v27 = vld [vmem:[#allocation2 + $0xc8] ss:$16 sps:$4 sm:$0xff]   ;;  %v1152_v28 = vld [vmem:[#allocation2 + $0xe4] ss:$16 sps:$4 sm:$0xff]  }
  0x34   : > { %631 = vmatpush1.bf16.msra.mxu0 %v1126_v10  ;;  %674 = vmatpush1.bf16.msra.mxu1 %v1127_v11  ;;  %v1154_v29 = vld [vmem:[#allocation2 + $0xec] ss:$16 sps:$4 sm:$0xff]   ;;  %v1156_v30 = vld [vmem:[#allocation2 + $0xe0] ss:$16 sps:$4 sm:$0xff]   ;;  %v1157_v31 = vld [vmem:[#allocation2 + $0xe8] ss:$16 sps:$4 sm:$0xff]  }
  0x35   : > { %632 = vmatprep.subr.bf16.mxu0 %v1128_v12  ;;  %675 = vmatprep.subr.bf16.mxu1 %v1130_v13  ;;  %v1158_v32 = vld [vmem:[#allocation2 + $0x104] ss:$16 sps:$4 sm:$0xff]   ;;  %p203_p2 = scmp.lt.s32.totalorder %s1300_s16, 1  ;;  %v1160_v33 = vld [vmem:[#allocation2 + $0x10c] ss:$16 sps:$4 sm:$0xff]   ;;  %v227_v40 = vshrl.u32 %v226_v36, 7 }
  0x36   : > { %v1162_v34 = vld [vmem:[#allocation2 + $0x100] ss:$16 sps:$4 sm:$0xff]   ;;  %v1163_v35 = vld [vmem:[#allocation2 + $0x108] ss:$16 sps:$4 sm:$0xff]   ;;  %v1164_v37 = vld [vmem:[#allocation2 + $0x124] ss:$16 sps:$4 sm:$0xff]  }
  0x37   : > { %s1421_s16 = smov (!%p203_p2, %s1300_s16), 1  ;;  %v1166_v38 = vld [vmem:[#allocation2 + $0x12c] ss:$16 sps:$4 sm:$0xff]   ;;  %v1168_v39 = vld [vmem:[#allocation2 + $0x120] ss:$16 sps:$4 sm:$0xff]   ;;  %v232_v47 = vsub.s32 1, %v227_v40 }
  0x38   : > { %633 = vmatpush1.bf16.msra.mxu0 %v1132_v14  ;;  %676 = vmatpush1.bf16.msra.mxu1 %v1133_v15  ;;  %v1169_v41 = vld [vmem:[#allocation2 + $0x128] ss:$16 sps:$4 sm:$0xff]   ;;  %v1170_v42 = vld [vmem:[#allocation2 + $0x144] ss:$16 sps:$4 sm:$0xff]   ;;  %s1065_s7 = sshll.u32 %s1421_s16, 4  ;;  %vm218_vm0 = vcmask 1046528  }
  0x39   : > { %634 = vmatprep.subr.bf16.mxu0 %v1134_v16  ;;  %677 = vmatprep.subr.bf16.mxu1 %v1136_v17  ;;  %v1172_v43 = vld [vmem:[#allocation2 + $0x14c] ss:$16 sps:$4 sm:$0xff]   ;;  %v1174_v44 = vld [vmem:[#allocation2 + $0x140] ss:$16 sps:$4 sm:$0xff]   ;;  %v1175_v45 = vld [vmem:[#allocation2 + $0x148] ss:$16 sps:$4 sm:$0xff]   ;;  %s207_s10 = scalar_lea.vmem %s1408_s0, %s1065_s7  ;;  %s212_s26 = scalar_lea.vmem %s1412_s4, %s1065_s7 }
  0x3a   : > { %v1176_v46 = vld [vmem:[#allocation2 + $0x164] ss:$16 sps:$4 sm:$0xff]   ;;  %v1178_v48 = vld [vmem:[#allocation2 + $0x16c] ss:$16 sps:$4 sm:$0xff]   ;;  %v1180_v49 = vld [vmem:[#allocation2 + $0x160] ss:$16 sps:$4 sm:$0xff]  }
  0x3b   : > { %v1181_v50 = vld [vmem:[#allocation2 + $0x168] ss:$16 sps:$4 sm:$0xff]   ;;  %v214_v51 = vld [vmem:[%s207_s10] sm:$0xff]  ;;  %v1184_v53 = vld [vmem:[#allocation2 + $0x18c] ss:$16 sps:$4 sm:$0xff]   ;;  %v228_v58 = vsub.s32 0, %v227_v40 }
  0x3c   : > { %635 = vmatpush1.bf16.msra.mxu0 %v1138_v18  ;;  %678 = vmatpush1.bf16.msra.mxu1 %v1139_v19  ;;  %v1182_v52 = vld [vmem:[#allocation2 + $0x184] ss:$16 sps:$4 sm:$0xff]   ;;  %v215_v54 = vld [vmem:[%s207_s10 + $0x8] sm:$0x1f]  ;;  %v219_v55 = vrot.slane %v214_v51, 1 }
  0x3d   : > { %636 = vmatprep.subr.bf16.mxu0 %v1140_v20  ;;  %679 = vmatprep.subr.bf16.mxu1 %v1142_v21  ;;  %v224_v56 = vld [vmem:[%s1409_s1] sm:$0x3]  ;;  %v220_v57 = vrot.slane %v215_v54, 1  ;;  %v1187_v63 = vld [vmem:[#allocation2 + $0x188] ss:$16 sps:$4 sm:$0xff]  }
  0x3e   : > { %v233_v59 = vrot.slane %v224_v56, %v232_v47  ;;  %v1186_v60 = vld [vmem:[#allocation2 + $0x180] ss:$16 sps:$4 sm:$0xff]   ;;  %v1188_v1 = vld [vmem:[#allocation2 + $0x1a4] ss:$16 sps:$4 sm:$0xff]   ;;  %v1190_v2 = vld [vmem:[#allocation2 + $0x1ac] ss:$16 sps:$4 sm:$0xff]   ;;  %v229_v12 = vrot.slane %v224_v56, %v228_v58 }
  0x3f   : > { %v221_v61 = vsel %vm218_vm0, %v219_v55, %v220_v57  ;;  %v1192_v4 = vld [vmem:[#allocation2 + $0x1a0] ss:$16 sps:$4 sm:$0xff]   ;;  %v1193_v5 = vld [vmem:[#allocation2 + $0x1a8] ss:$16 sps:$4 sm:$0xff]   ;;  %v1194_v6 = vld [vmem:[#allocation2 + $0x1c4] ss:$16 sps:$4 sm:$0xff]  }
  0x40   : > { %637 = vmatpush1.bf16.msra.mxu0 %v1144_v22  ;;  %680 = vmatpush1.bf16.msra.mxu1 %v1145_v23  ;;  %v239_v62 = vmul.f32 %v233_v59, %v220_v57  ;;  %v237_v0 = vmul.f32 %v233_v59, %v221_v61  ;;  %v1196_v7 = vld [vmem:[#allocation2 + $0x1cc] ss:$16 sps:$4 sm:$0xff]   ;;  %v1198_v8 = vld [vmem:[#allocation2 + $0x1c0] ss:$16 sps:$4 sm:$0xff]   ;;  %v1199_v9 = vld [vmem:[#allocation2 + $0x1c8] ss:$16 sps:$4 sm:$0xff]   ;;  %v236_v13 = vmul.f32 %v229_v12, %v214_v51 }
  0x41   : > { %638 = vmatprep.subr.bf16.mxu0 %v1146_v24  ;;  %681 = vmatprep.subr.bf16.mxu1 %v1148_v25  ;;  %v1200_v10 = vld [vmem:[#allocation2 + $0x1e4] ss:$16 sps:$4 sm:$0xff]   ;;  %v1202_v11 = vld [vmem:[#allocation2 + $0x1ec] ss:$16 sps:$4 sm:$0xff]   ;;  %v238_v14 = vmul.f32 %v229_v12, %v215_v54  ;;  %v1204_v15 = vld [vmem:[#allocation2 + $0x1e0] ss:$16 sps:$4 sm:$0xff]  }
  0x42   : > { %v241_v3 = vpack.c.bf16 %v239_v62, %v237_v0  ;;  %v1205_v16 = vld [vmem:[#allocation2 + $0x1e8] ss:$16 sps:$4 sm:$0xff]   ;;  %v1206_v17 = vld [vmem:[%s1411_s3 + $0x40] sm:$0xff]   ;;  %v1210_v22 = vld [vmem:[%s1411_s3 + $0x50] sm:$0xff]  }
  0x43   : > { %v240_v18 = vpack.c.bf16 %v238_v14, %v236_v13  ;;  %v1207_v19 = vld [vmem:[%s1411_s3] sm:$0xff]   ;;  %v1208_v20 = vld [vmem:[%s1411_s3 + $0x48] sm:$0xff]   ;;  %v1211_v23 = vld [vmem:[%s1411_s3 + $0x10] sm:$0xff]  }
  0x44   : > { %639 = vmatpush1.bf16.msra.mxu0 %v1150_v26  ;;  %682 = vmatpush1.bf16.msra.mxu1 %v1151_v27  ;;  %v1209_v21 = vld [vmem:[%s1411_s3 + $0x8] sm:$0xff]   ;;  %v1212_v24 = vld [vmem:[%s1411_s3 + $0x58] sm:$0xff]   ;;  %v1214_v26 = vld [vmem:[%s1411_s3 + $0x60] sm:$0xff]  }
  0x45   : > { %640 = vmatprep.subr.bf16.mxu0 %v1152_v28  ;;  %683 = vmatprep.subr.bf16.mxu1 %v1154_v29  ;;  %v1213_v25 = vld [vmem:[%s1411_s3 + $0x18] sm:$0xff]   ;;  %v1215_v27 = vld [vmem:[%s1411_s3 + $0x20] sm:$0xff]   ;;  %v1216_v28 = vld [vmem:[%s1411_s3 + $0x68] sm:$0xff]  }
  0x46   : > { %658 = vmatprep.mubr.bf16.mxu0 %v241_v3  ;;  %701 = vmatprep.mubr.bf16.mxu1 %v241_v3  ;;  %v1217_v29 = vld [vmem:[%s1411_s3 + $0x28] sm:$0xff]  }
  0x48   : > { %641 = vmatpush1.bf16.msra.mxu0 %v1156_v30  ;;  %684 = vmatpush1.bf16.msra.mxu1 %v1157_v31  ;;  %v1218_v30 = vld [vmem:[%s1411_s3 + $0x70] sm:$0xff]  }
  0x49   : > { %642 = vmatprep.subr.bf16.mxu0 %v1158_v32  ;;  %685 = vmatprep.subr.bf16.mxu1 %v1160_v33  ;;  %v1219_v31 = vld [vmem:[%s1411_s3 + $0x30] sm:$0xff]   ;;  %v1220_v32 = vld [vmem:[%s1411_s3 + $0x78] sm:$0xff]  }
  0x4a   : > { %v1221_v33 = vld [vmem:[%s1411_s3 + $0x38] sm:$0xff]  }
  0x4c   : > { %643 = vmatpush1.bf16.msra.mxu0 %v1162_v34  ;;  %686 = vmatpush1.bf16.msra.mxu1 %v1163_v35 }
  0x4d   : > { %644 = vmatprep.subr.bf16.mxu0 %v1164_v37  ;;  %687 = vmatprep.subr.bf16.mxu1 %v1166_v38 }
  0x50   : > { %645 = vmatpush1.bf16.msra.mxu0 %v1168_v39  ;;  %688 = vmatpush1.bf16.msra.mxu1 %v1169_v41 }
  0x51   : > { %646 = vmatprep.subr.bf16.mxu0 %v1170_v42  ;;  %689 = vmatprep.subr.bf16.mxu1 %v1172_v43 }
  0x54   : > { %647 = vmatpush1.bf16.msra.mxu0 %v1174_v44  ;;  %690 = vmatpush1.bf16.msra.mxu1 %v1175_v45 }
  0x55   : > { %648 = vmatprep.subr.bf16.mxu0 %v1176_v46  ;;  %691 = vmatprep.subr.bf16.mxu1 %v1178_v48 }
  0x58   : > { %649 = vmatpush1.bf16.msra.mxu0 %v1180_v49  ;;  %692 = vmatpush1.bf16.msra.mxu1 %v1181_v50 }
  0x59   : > { %650 = vmatprep.subr.bf16.mxu0 %v1182_v52  ;;  %693 = vmatprep.subr.bf16.mxu1 %v1184_v53 }
  0x5c   : > { %651 = vmatpush1.bf16.msra.mxu0 %v1186_v60  ;;  %694 = vmatpush1.bf16.msra.mxu1 %v1187_v63 }
  0x5d   : > { %652 = vmatprep.subr.bf16.mxu0 %v1188_v1  ;;  %695 = vmatprep.subr.bf16.mxu1 %v1190_v2 }
  0x60   : > { %653 = vmatpush1.bf16.msra.mxu0 %v1192_v4  ;;  %696 = vmatpush1.bf16.msra.mxu1 %v1193_v5 }
  0x61   : > { %654 = vmatprep.subr.bf16.mxu0 %v1194_v6  ;;  %697 = vmatprep.subr.bf16.mxu1 %v1196_v7 }
  0x64   : > { %655 = vmatpush1.bf16.msra.mxu0 %v1198_v8  ;;  %698 = vmatpush1.bf16.msra.mxu1 %v1199_v9 }
  0x65   : > { %656 = vmatprep.subr.bf16.mxu0 %v1200_v10  ;;  %699 = vmatprep.subr.bf16.mxu1 %v1202_v11 }
  0x68   : > { %657 = vmatpush1.bf16.msra.mxu0 %v1204_v15  ;;  %700 = vmatpush1.bf16.msra.mxu1 %v1205_v16 }
  0x69   : > { %1067 = vmatprep.subr.bf16.mxu0 %v1206_v17 }
  0x6b   : > { %659 = vmatmul.mubr.bf16.vlgmr.msra.gmra.mrb[0].mxu0 %v240_v18  ;;  %702 = vmatmul.mubr.bf16.vlgmr.msra.gmra.mrb[0].mxu1 %v240_v18 }
  0x6c   : > { %1068 = vmatpush3.bf16.msra.mxu0 %v1207_v19 }
  0x6d   : > { %1069 = vmatprep.subr.bf16.mxu0 %v1208_v20 }
  0x70   : > { %1070 = vmatpush3.bf16.msra.mxu0 %v1209_v21 }
  0x71   : > { %1071 = vmatprep.subr.bf16.mxu0 %v1210_v22 }
  0x74   : > { %1072 = vmatpush3.bf16.msra.mxu0 %v1211_v23 }
  0x75   : > { %1073 = vmatprep.subr.bf16.mxu0 %v1212_v24 }
  0x78   : > { %1074 = vmatpush3.bf16.msra.mxu0 %v1213_v25 }
  0x79   : > { %1075 = vmatprep.subr.bf16.mxu0 %v1214_v26 }
  0x7c   : > { %1076 = vmatpush3.bf16.msra.mxu0 %v1215_v27 }
  0x7d   : > { %1077 = vmatprep.subr.bf16.mxu0 %v1216_v28 }
  0x80   : > { %1078 = vmatpush3.bf16.msra.mxu0 %v1217_v29 }
  0x81   : > { %1079 = vmatprep.subr.bf16.mxu0 %v1218_v30 }
  0x84   : > { %1080 = vmatpush3.bf16.msra.mxu0 %v1219_v31 }
  0x85   : > { %1081 = vmatprep.subr.bf16.mxu0 %v1220_v32 }
  0x88   : > { %1082 = vmatpush3.bf16.msra.mxu0 %v1221_v33 }
 0x13e   : > { %v660_v34 = vpop.f32.mrb[0].mxu0  ;;  %v703_v35 = vpop.f32.mrb[0].mxu1 }
 0x13f   : > { %v712_v36 = vmul.f32 %v660_v34, %v660_v34  ;;  %v716_v37 = vmul.f32 %v703_v35, %v703_v35  ;;  %v662_v38 = vpop.f32.mrb[1].mxu0  ;;  %v705_v39 = vpop.f32.mrb[1].mxu1 }
 0x140   : > { %v713_v40 = vmul.f32 %v662_v38, %v662_v38  ;;  %v717_v41 = vmul.f32 %v705_v39, %v705_v39  ;;  %v664_v42 = vpop.f32.mrb[2].mxu0  ;;  %v707_v43 = vpop.f32.mrb[2].mxu1 }
 0x141   : > { %v720_v44 = vadd.f32 %v716_v37, %v712_v36  ;;  %v714_v45 = vmul.f32 %v664_v42, %v664_v42  ;;  %v718_v46 = vmul.f32 %v707_v43, %v707_v43  ;;  %v666_v47 = vpop.f32.mrb[3].mxu0  ;;  %v709_v48 = vpop.f32.mrb[3].mxu1 }
 0x142   : > { %v721_v49 = vadd.f32 %v717_v41, %v713_v40  ;;  %v715_v50 = vmul.f32 %v666_v47, %v666_v47  ;;  %v719_v51 = vmul.f32 %v709_v48, %v709_v48 }
 0x143   : > { %v722_v52 = vadd.f32 %v718_v46, %v714_v45 }
 0x144   : > { %v723_v53 = vadd.f32 %v719_v51, %v715_v50 }
 0x145   : > { %v724_v54 = vpack.c.bf16 %v722_v52, %v720_v44 }
 0x146   : > { %v725_v55 = vpack.c.bf16 %v723_v53, %v721_v49 }
 0x148   : > { %886 = vmatprep.mubr.bf16.mxu0 %v725_v55 }
 0x149   : > { %887 = vmatmul.mubr.bf16.vlgmr.msra.gmra.mrb[4].mxu0 %v724_v54 }
 0x21c   : > { %v1083_v56 = vpop.f32.mrb[4].mxu0 }
 0x21d   : > { %v1084_v57 = vpop.f32.mrb[5].mxu0 }
 0x21e   : > { %v1085_v58 = vadd.f32 %v1084_v57, %v1083_v56  ;;  %v1086_v59 = vpop.f32.mrb[6].mxu0 }
 0x21f   : > { %v1087_v60 = vpop.f32.mrb[7].mxu0 }
 0x220   : > { %v895_v61 = vmax.f32 %v1085_v58, 1e-10  ;;  %v1088_v62 = vadd.f32 %v1087_v60, %v1086_v59 }
 0x222   : > { %1222 = vlog2.f32 %v895_v61  ;;  %v896_v63 = vmax.f32 %v1088_v62, 1e-10 }
 0x224   : > { %1224 = vlog2.f32 %v896_v63 }
 0x22c   : > { %v1223_v0 = vpop.eup %1222 }
 0x22d   : > { %v898_v1 = vmul.f32 0.6931472, %v1223_v0 }
 0x22e   : > { %v1225_v2 = vpop.eup %1224 }
 0x22f   : > { %v901_v3 = vmul.f32 4.3429446, %v898_v1  ;;  %v900_v4 = vmul.f32 0.6931472, %v1225_v2 }
 0x231   : > { %903 = vst [vmem:[%s212_s26] sm:$0xff] %v901_v3  ;;  %v902_v5 = vmul.f32 4.3429446, %v900_v4 }
 0x233   : > { %904 = vst [vmem:[%s212_s26 + $0x8] sm:$0xf] %v902_v5 }
 0x234 PF: > { %s15_s15 = sadd.s32 1, %s1264_s15  }
 0x235   : > { %p12_p3 = scmp.ge.s32.totalorder %s15_s15, 4  }
 0x237   :  { %14 = sbr.rel (!%p12_p3) target bundleno = 1 (0x1), region = 71 }
 0x23e   :  { %926 = vsyncpa [#allocation3], 1 }
 0x23f   :  { %928 = vsyncpa [#allocation3 + $0x1], 1 }

// kernel: forward.3
= control target key start
LH: loop header
LB: loop body
LE: loop exit
PB: predicated region body
PF: predicated region fallthrough
CT: control target
= control target key end

     0   :  { %s4435_s0 = inlined_call_operand.vmem [shape: f32[2,8,128], index: 0, kind: input, shape index: {}]   ;;  %s4436_s1 = inlined_call_operand.vmem [shape: bf16[128,128], index: 1, kind: input, shape index: {}]   ;;  %s4437_s2 = inlined_call_operand.vmem [shape: f32[1,128], index: 2, kind: input, shape index: {}]   ;;  %s4438_s3 = inlined_call_operand.vmem [shape: f32[9,128], index: 3, kind: input, shape index: {}]   ;;  %s4439_s4 = inlined_call_operand.vmem [shape: bf16[2,128,384], index: 4, kind: input, shape index: {}]   ;;  %s4440_s5 = inlined_call_operand.vmem [shape: f32[2,1,384], index: 5, kind: input, shape index: {}]   ;;  %s4441_s6 = inlined_call_operand.vmem [shape: bf16[2,128,128], index: 6, kind: input, shape index: {}]   ;;  %s4442_s7 = inlined_call_operand.vmem [shape: f32[2,1,128], index: 7, kind: input, shape index: {}]   ;;  %s4443_s8 = inlined_call_operand.vmem [shape: f32[2,1,128], index: 8, kind: input, shape index: {}]   ;;  %s4444_s9 = inlined_call_operand.vmem [shape: f32[2,1,128], index: 9, kind: input, shape index: {}]   ;;  %s4445_s10 = inlined_call_operand.vmem [shape: bf16[2,128,256], index: 10, kind: input, shape index: {}]   ;;  %s4446_s11 = inlined_call_operand.vmem [shape: f32[2,1,256], index: 11, kind: input, shape index: {}]   ;;  %s4447_s12 = inlined_call_operand.vmem [shape: bf16[2,256,128], index: 12, kind: input, shape index: {}]   ;;  %s4448_s13 = inlined_call_operand.vmem [shape: f32[2,1,128], index: 13, kind: input, shape index: {}]   ;;  %s4449_s14 = inlined_call_operand.vmem [shape: f32[2,1,128], index: 14, kind: input, shape index: {}]   ;;  %s4450_s15 = inlined_call_operand.vmem [shape: f32[2,1,128], index: 15, kind: input, shape index: {}]   ;;  %s4451_s16 = inlined_call_operand.vmem [shape: f32[1,128], index: 16, kind: input, shape index: {}]   ;;  %s4452_s17 = inlined_call_operand.vmem [shape: f32[1,128], index: 17, kind: input, shape index: {}]   ;;  %s4453_s18 = inlined_call_operand.vmem [shape: bf16[128,128], index: 18, kind: input, shape index: {}]   ;;  %s4454_s19 = inlined_call_operand.vmem [shape: f32[1,128], index: 19, kind: input, shape index: {}]   ;;  %s4455_s20 = inlined_call_operand.hbm [shape: f32[2,1,128], index: 20, kind: output, shape index: {}]  }
   0x1   :  { %4472 = sst [smem:[#allocation19_spill]] %s4435_s0 }
   0x2   :  { %4473 = sst [smem:[#allocation20_spill]] %s4436_s1 }
   0x3   :  { %4474 = sst [smem:[#allocation21_spill]] %s4437_s2 }
   0x4   :  { %4475 = sst [smem:[#allocation22_spill]] %s4438_s3 }
   0x5   :  { %4476 = sst [smem:[#allocation23_spill]] %s4439_s4 }
   0x6   :  { %4477 = sst [smem:[#allocation24_spill]] %s4440_s5 }
   0x7   :  { %4478 = sst [smem:[#allocation25_spill]] %s4441_s6 }
   0x8   :  { %4479 = sst [smem:[#allocation26_spill]] %s4445_s10 }
   0x9   :  { %4480 = sst [smem:[#allocation27_spill]] %s4451_s16 }
   0xa   :  { %4481 = sst [smem:[#allocation28_spill]] %s4452_s17 }
   0xb   :  { %4482 = sst [smem:[#allocation29_spill]] %s4453_s18 }
   0xc   :  { %4483 = sst [smem:[#allocation30_spill]] %s4454_s19 }
   0xd   :  { %4484 = sst [smem:[#allocation31_spill]] %s4455_s20 }
   0xe   :  { %25 = vsyncpa [#allocation4], 0 }
   0xf   :  { %27 = vsyncpa [#allocation4 + $0x1], 0  ;;  %s3864_s1 = smov 0   ;;  %s3866_s22 = smov 0  }
  0x10   :  { %s3868_s23 = smov 0   ;;  %s3870_s24 = smov 0  }
  0x11   :  { %s3872_s2 = smov 0   ;;  %s3874_s25 = smov 0  }
  0x12   :  { %s3876_s3 = smov 0   ;;  %s3878_s26 = smov 0  }
  0x13 LB: > { %4485 = sst [smem:[#allocation6_spill]] %s3717_s1  ;;  %s2965_s27 = sadd.s32 4294967295, %s3745_s26   ;;  %s3745_s26 = sphi %s3878_s26, %s33_s26   ;;  %s3741_s3 = sphi %s3876_s3, %s4536_s3   ;;  %s3737_s25 = sphi %s3874_s25, %s4539_s25   ;;  %s3733_s2 = sphi %s3872_s2, %s4534_s2   ;;  %s3729_s24 = sphi %s3870_s24, %s4533_s24   ;;  %s3725_s23 = sphi %s3868_s23, %s4532_s23   ;;  %s3721_s22 = sphi %s3866_s22, %s4538_s22   ;;  %s3717_s1 = sphi %s3864_s1, %s4537_s1  }
  0x14   : > { %4486 = sst [smem:[#allocation7_spill]] %s3725_s23  ;;  %s2966_s28 = sadd.s32 4294967294, %s3745_s26  }
  0x15   : > { %4487 = sst [smem:[#allocation8_spill]] %s3729_s24  ;;  %s42_s4 = sadd.s32 1, %s3737_s25 }
  0x16   : > { %4488 = sst [smem:[#allocation9_spill]] %s3733_s2  ;;  %p43_p0 = scmp.ge.s32.totalorder %s42_s4, 2 }
  0x17   : > { %4489 = sst [smem:[#allocation10_spill]] %s3737_s25  ;;  %s45_s29 = sadd.s32 1, %s3741_s3 }
  0x18   : > { %4490 = sst [smem:[#allocation11_spill]] %s3741_s3  ;;  %p547_p1 = scmp.ne.s32.totalorder %s3725_s23, %s3721_s22 }
  0x19   : > { %4491 = sst [smem:[#allocation12_spill]] %s3745_s26  ;;  %p548_p2 = scmp.eq.s32.totalorder %s2965_s27, 3 }
  0x1a   : > { %s4541_s4 = smov (%p43_p0, %s42_s4), 0  ;;  %s4543_s29 = smov (!%p43_p0, %s45_s29), %s3741_s3 }
  0x1b   : > { %4492 = sst [smem:[#allocation13_spill]] %s4541_s4  ;;  %p3913_p3 = por %p548_p2, %p547_p1 }
  0x1c   : > { %p553_p4 = scmp.ne.s32.totalorder %s3721_s22, %s3717_s1  ;;  %p47_p5 = scmp.ge.s32.totalorder %s4543_s29, 2 }
  0x1d   : > { %s4493_s30 = scalar_select %p3913_p3, 1, 0 }
  0x1e   : > { %p554_p6 = scmp.eq.s32.totalorder %s2966_s28, 3  ;;  %p2969_p7 = scmp.ge.s32.totalorder %s3745_s26, 1 }
  0x1f   : > { %4494 = sst [smem:[#allocation14_spill]] %s4493_s30  ;;  %p682_p8 = scmp.lt.s32.totalorder %s3745_s26, 5 }
  0x20   : > { %s4545_s29 = smov (%p47_p5, %s4543_s29), 0  ;;  %p3923_p9 = por %p554_p6, %p553_p4 }
  0x21   : > { %4495 = sst [smem:[#allocation15_spill]] %s4545_s29  ;;  %p683_p10 = pnand %p2969_p7, %p682_p8 }
  0x22   : > { %s4496_s0 = scalar_select %p3923_p9, 1, 0 }
  0x23   : > { %s534_s21 = ssub.s32 %s3741_s3, %s4545_s29  ;;  %s537_s27 = sadd.s32 1, %s3725_s23 }
  0x24   : > { %4497 = sst [smem:[#allocation16_spill]] %s4496_s0  ;;  %p535_p11 = scmp.eq.s32.totalorder %s534_s21, 0 }
  0x25   : > { %686 = sbr.rel (%p683_p10) target bundleno = 4407 (0x1137), region = 100 }
  0x26   : > { %s3931_s4 = scalar_select %p535_p11, %s3725_s23, %s537_s27  }
  0x28   : > { %4498 = sst [smem:[#allocation17_spill]] %s3931_s4 }
  0x2c   : > { %p784_p12 = scmp.lt.s32.totalorder %s3733_s2, 1  ;;  %p788_p13 = scmp.lt.s32.totalorder %s3729_s24, 1 }
  0x2d   : > { %s4499_s3 = sld [smem:[#allocation19_spill]]  ;;  %s4501_s30 = sld [smem:[#allocation23_spill]] }
  0x2e   : > { %s785_s25 = scalar_select %p784_p12, %s3733_s2, 1 }
  0x2f   : > { %s3938_s1 = scalar_select %p788_p13, %s3729_s24, 1 }
  0x30   : > { %s2970_s21 = sshll.u32 %s785_s25, 3  ;;  %s4502_s6 = sld [smem:[#allocation25_spill]] }
  0x31   : > { %s3376_s28 = smul.u32 192, %s3938_s1  ;;  %s3099_s0 = sshll.u32 %s3938_s1, 6 }
  0x32   : > { %s3377_s23 = smul.u32 3, %s3938_s1  ;;  %s4503_s5 = sld [smem:[#allocation24_spill]] }
  0x33   : > { %s3943_s4 = scalar_lea.vmem %s4499_s3, %s2970_s21  ;;  %s3951_s2 = scalar_lea.vmem %s4501_s30, %s3376_s28 }
  0x34   : > { %4500 = sst [smem:[#allocation18_spill]] %s3943_s4  ;;  %s3100_s17 = sshll.u32 %s3938_s1, 7 }
  0x35   : > { %s2976_s19 = sshll.u32 %s3938_s1, 1  ;;  %s4504_s10 = sld [smem:[#allocation26_spill]] }
  0x36   : > { %s3956_s25 = scalar_lea.vmem %s4502_s6, %s3099_s0  ;;  %s3985_s16 = scalar_lea.vmem %s4446_s11, %s2976_s19 }
  0x37   : > { %s3990_s24 = scalar_lea.vmem %s4447_s12, %s3100_s17  ;;  %s827_s30 = scalar_lea.vmem %s4448_s13, %s3938_s1 }
  0x38   : > { %s3961_s3 = scalar_lea.vmem %s4503_s5, %s3377_s23  ;;  %s830_s6 = scalar_lea.vmem %s4449_s14, %s3938_s1 }
  0x39   : > { %s4505_s23 = sand.u32 1, %s3721_s22   ;;  %s4506_s27 = sld [smem:[#allocation8_spill]] }
  0x3a   : > { %s4006_s19 = scalar_lea.vmem [#allocation3], %s4505_s23 }
  0x3b   : > { %s3980_s29 = scalar_lea.vmem %s4504_s10, %s3100_s17  ;;  %s833_s10 = scalar_lea.vmem %s4450_s15, %s3938_s1 }
  0x3f   : > { %p2979_p0 = scmp.ne.s32.totalorder %s4506_s27, 0 }
  0x40   : > { %s4507_s21 = sld [smem:[#allocation20_spill]] (!%p2979_p0)  ;;  %v3747_v1 = vmov (!%p2979_p0), 0.0   ;;  %vm3748_vm0 = vmmov (!%p2979_p0), 0   ;;  %s4509_s18 = sld [smem:[#allocation21_spill]] (!%p2979_p0)  ;;  %vm955_vm1 = vcmask (!%p2979_p0), 1040384  }
  0x41   : > { %838 = sbr.rel (%p2979_p0) target bundleno = 322 (0x142), region = 104  ;;  %3192 = vmatprep.subr.bf16.mxu0 (!%p2979_p0), %v3747_v1  ;;  %3208 = vmatprep.mubr.msk.bf16.mxu0 (!%p2979_p0), %vm3748_vm0, %v3747_v1  ;;  %s4508_s26 = sld [smem:[#allocation18_spill]] (!%p2979_p0) }
  0x42   : > { %s4510_s20 = sld [smem:[#allocation22_spill]] (!%p2979_p0) }
  0x46   : > { %v3460_v0 = vld [vmem:[%s4507_s21] sm:$0xff] (!%p2979_p0)   ;;  %v3461_v2 = vld [vmem:[%s4507_s21 + $0x8] sm:$0xff] (!%p2979_p0)   ;;  %v3462_v3 = vld [vmem:[%s4507_s21 + $0x10] sm:$0xff] (!%p2979_p0)  }
  0x47   : > { %3193 = vmatpush3.bf16.msra.mxu0 (!%p2979_p0), %v3460_v0  ;;  %v3463_v4 = vld [vmem:[%s4507_s21 + $0x18] sm:$0xff] (!%p2979_p0)   ;;  %v3464_v5 = vld [vmem:[%s4507_s21 + $0x20] sm:$0xff] (!%p2979_p0)   ;;  %v3465_v6 = vld [vmem:[%s4507_s21 + $0x28] sm:$0xff] (!%p2979_p0)  }
  0x48   : > { %3194 = vmatprep.subr.bf16.mxu0 %v3747_v1  ;;  %v3466_v7 = vld [vmem:[%s4507_s21 + $0x30] sm:$0xff]   ;;  %v3467_v8 = vld [vmem:[%s4507_s21 + $0x38] sm:$0xff]   ;;  %v839_v9 = vld [vmem:[%s4508_s26] sm:$0xff] }
  0x49   : > { %v840_v10 = vpack.c.bf16 %v839_v9, %v839_v9  ;;  %v2980_v11 = vld [vmem:[%s4509_s18] ss:$0 sm:$0xff]  ;;  %v958_v15 = vld [vmem:[%s4510_s20 + $0x8] sm:$0x1] }
  0x4a   : > { %v957_v18 = vld [vmem:[%s4510_s20] sm:$0xff] }
  0x4b   : > { %3195 = vmatpush3.bf16.msra.mxu0 %v3461_v2 }
  0x4c   : > { %3196 = vmatprep.subr.bf16.mxu0 %v3747_v1 }
  0x4f   : > { %3197 = vmatpush3.bf16.msra.mxu0 %v3462_v3 }
  0x50   : > { %3198 = vmatprep.subr.bf16.mxu0 %v3747_v1 }
  0x53   : > { %3199 = vmatpush3.bf16.msra.mxu0 %v3463_v4 }
  0x54   : > { %3200 = vmatprep.subr.bf16.mxu0 %v3747_v1 }
  0x57   : > { %3201 = vmatpush3.bf16.msra.mxu0 %v3464_v5 }
  0x58   : > { %3202 = vmatprep.subr.bf16.mxu0 %v3747_v1 }
  0x5b   : > { %3203 = vmatpush3.bf16.msra.mxu0 %v3465_v6 }
  0x5c   : > { %3204 = vmatprep.subr.bf16.mxu0 %v3747_v1 }
  0x5f   : > { %3205 = vmatpush3.bf16.msra.mxu0 %v3466_v7 }
  0x60   : > { %3206 = vmatprep.subr.bf16.mxu0 %v3747_v1 }
  0x63   : > { %3207 = vmatpush3.bf16.msra.mxu0 %v3467_v8 }
  0x66   : > { %3209 = vmatmul.mubr.bf16.vlgmr.msra.gmra.mrb[0].mxu0 %v840_v10 }
 0x139   : > { %v946_v12 = vpop.f32.mrb[0].mxu0 }
 0x13a   : > { %v947_v13 = vadd.f32 %v2980_v11, %v946_v12  ;;  %v3210_v14 = vpop.f32.mrb[1].mxu0 }
 0x13b   : > { %v949_v16 = vpop.f32.mrb[2].mxu0 }
 0x13c   : > { %v953_v17 = vrot.slane %v947_v13, 7  ;;  %v3211_v19 = vpop.f32.mrb[3].mxu0 }
 0x13e   : > { %v956_v20 = vsel %vm955_vm1, 0.0, %v953_v17  ;;  %v960_v21 = vadd.f32 %v958_v15, %v953_v17 }
 0x13f   : > { %v959_v22 = vadd.f32 %v957_v18, %v956_v20 }
 0x140   : > { %962 = vst [vmem:[#allocation2 + $0x8] sm:$0x1] %v960_v21 }
 0x141   : > { %961 = vst [vmem:[#allocation2] sm:$0xff] %v959_v22 }
 0x142 PF: > { %v3513_v23 = vld [vmem:[%s3951_s2 + $0x4] ss:$12 sps:$4 sm:$0xff]   ;;  %v3515_v24 = vld [vmem:[%s3951_s2] ss:$12 sps:$4 sm:$0xff]   ;;  %v3749_v25 = vmov 0   ;;  %v1000_v43 = vlaneseq  ;;  %v3750_v50 = vmov 0.0   ;;  %s4515_s23 = scalar_lea.vmem %s4442_s7, %s3938_s1  ;;  %s4517_s5 = scalar_lea.vmem %s4444_s9, %s3938_s1 }
 0x143   : > { %1175 = vmatprep.mubr.bf16.mxu0 %v3749_v25  ;;  %1143 = vmatprep.subr.bf16.mxu0 %v3513_v23  ;;  %v3516_v26 = vld [vmem:[%s3951_s2 + $0x1c] ss:$12 sps:$4 sm:$0xff]   ;;  %v3518_v27 = vld [vmem:[%s3951_s2 + $0x18] ss:$12 sps:$4 sm:$0xff]   ;;  %v3519_v28 = vld [vmem:[%s3951_s2 + $0x34] ss:$12 sps:$4 sm:$0xff]  }
 0x144   : > { %1144 = vmatpush1.bf16.msra.mxu0 %v3515_v24  ;;  %v3521_v29 = vld [vmem:[%s3951_s2 + $0x30] ss:$12 sps:$4 sm:$0xff]   ;;  %v3522_v30 = vld [vmem:[%s3951_s2 + $0x4c] ss:$12 sps:$4 sm:$0xff]   ;;  %v3524_v31 = vld [vmem:[%s3951_s2 + $0x48] ss:$12 sps:$4 sm:$0xff]   ;;  %3212 = vmatprep.subr.bf16.mxu1 %v3750_v50 }
 0x145   : > { %1145 = vmatprep.subr.bf16.mxu0 %v3516_v26  ;;  %v3525_v32 = vld [vmem:[%s3951_s2 + $0x64] ss:$12 sps:$4 sm:$0xff]   ;;  %v3527_v33 = vld [vmem:[%s3951_s2 + $0x60] ss:$12 sps:$4 sm:$0xff]   ;;  %v3528_v34 = vld [vmem:[%s3951_s2 + $0x7c] ss:$12 sps:$4 sm:$0xff]  }
 0x146   : > { %v3530_v35 = vld [vmem:[%s3951_s2 + $0x78] ss:$12 sps:$4 sm:$0xff]   ;;  %v3531_v36 = vld [vmem:[%s3951_s2 + $0x94] ss:$12 sps:$4 sm:$0xff]   ;;  %v3533_v37 = vld [vmem:[%s3951_s2 + $0x90] ss:$12 sps:$4 sm:$0xff]  }
 0x147   : > { %v3534_v38 = vld [vmem:[%s3951_s2 + $0xac] ss:$12 sps:$4 sm:$0xff]   ;;  %v3536_v39 = vld [vmem:[%s3951_s2 + $0xa8] ss:$12 sps:$4 sm:$0xff]   ;;  %v4066_v44 = vshrl.u32 %v1000_v43, 7  ;;  %vm3751_vm2 = vmmov 0  }
 0x148   : > { %1146 = vmatpush1.bf16.msra.mxu0 %v3518_v27  ;;  %v4060_v40 = vld [vmem:[#allocation2] sm:$0xff]  ;;  %v4062_v41 = vld [vmem:[#allocation2 + $0x8] sm:$0x1]  ;;  %3228 = vmatprep.mubr.msk.bf16.mxu1 %vm3751_vm2, %v3750_v50  ;;  %vm1229_vm3 = vcmask 261120   ;;  %v3540_v1 = vld [vmem:[%s3951_s2 + $0x50] ss:$12 sps:$4 sm:$0xff]  }
 0x149   : > { %1147 = vmatprep.subr.bf16.mxu0 %v3519_v28  ;;  %v965_v42 = vpack.c.bf16 %v4062_v41, %v4060_v40  ;;  %v1002_v45 = vsub.s32 0, %v4066_v44  ;;  %v4070_v46 = vld [vmem:[%s3961_s3] sm:$0x7]  ;;  %v1006_v47 = vsub.s32 1, %v4066_v44  ;;  %v3537_v49 = vld [vmem:[%s3951_s2 + $0x8] ss:$12 sps:$4 sm:$0xff]   ;;  %vm4091_vm4 = vmpackc.low %vm1229_vm3, %vm1229_vm3 }
 0x14a   : > { %3213 = vmatpush3.bf16.msra.mxu1 %v3537_v49  ;;  %v3538_v53 = vld [vmem:[%s3951_s2 + $0x20] ss:$12 sps:$4 sm:$0xff]   ;;  %v3539_v62 = vld [vmem:[%s3951_s2 + $0x38] ss:$12 sps:$4 sm:$0xff]   ;;  %s3752_s3 = smov 64   ;;  %s3753_s28 = smov 96  }
 0x14b   : > { %v1003_v48 = vrot.slane %v4070_v46, %v1002_v45  ;;  %v1007_v52 = vrot.slane %v4070_v46, %v1006_v47  ;;  %3214 = vmatprep.subr.bf16.mxu1 %v3750_v50  ;;  %v3541_v3 = vld [vmem:[%s3951_s2 + $0x68] ss:$12 sps:$4 sm:$0xff]   ;;  %v3542_v5 = vld [vmem:[%s3951_s2 + $0x80] ss:$12 sps:$4 sm:$0xff]   ;;  %v3543_v6 = vld [vmem:[%s3951_s2 + $0x98] ss:$12 sps:$4 sm:$0xff]  }
 0x14c   : > { %1148 = vmatpush1.bf16.msra.mxu0 %v3521_v29  ;;  %v3544_v7 = vld [vmem:[%s3951_s2 + $0xb0] ss:$12 sps:$4 sm:$0xff]   ;;  %vm1317_vm5 = vcmask 72704   ;;  %vm1321_vm6 = vcmask 65536   ;;  %v1010_v12 = vsub.s32 2, %v4066_v44  ;;  %vm1347_vm7 = vcmask 1040384  }
 0x14d   : > { %1149 = vmatprep.subr.bf16.mxu0 %v3522_v30  ;;  %vm3754_vm8 = vmmov 1   ;;  %s3755_s2 = smov 32   ;;  %v3547_v21 = vld [vmem:[%s3956_s25 + $0x10] sm:$0xff]   ;;  %vm2056_vm10 = vcmask 523264   ;;  %vm2059_vm11 = vcmask 785408  }
 0x14e   : > { %3215 = vmatpush3.bf16.msra.mxu1 %v3538_v53  ;;  %v1011_v14 = vrot.slane %v4070_v46, %v1010_v12  ;;  %vm4132_vm9 = vmpackc.low %vm1347_vm7, %vm3754_vm8 }
 0x14f   : > { %3216 = vmatprep.subr.bf16.mxu1 %v3750_v50 }
 0x150   : > { %1150 = vmatpush1.bf16.msra.mxu0 %v3524_v31 }
 0x151   : > { %1151 = vmatprep.subr.bf16.mxu0 %v3525_v32 }
 0x152   : > { %3217 = vmatpush3.bf16.msra.mxu1 %v3539_v62 }
 0x153   : > { %3218 = vmatprep.subr.bf16.mxu1 %v3750_v50 }
 0x154   : > { %1152 = vmatpush1.bf16.msra.mxu0 %v3527_v33 }
 0x155   : > { %1153 = vmatprep.subr.bf16.mxu0 %v3528_v34 }
 0x156   : > { %3219 = vmatpush3.bf16.msra.mxu1 %v3540_v1 }
 0x157   : > { %3220 = vmatprep.subr.bf16.mxu1 %v3750_v50 }
 0x158   : > { %1154 = vmatpush1.bf16.msra.mxu0 %v3530_v35 }
 0x159   : > { %1155 = vmatprep.subr.bf16.mxu0 %v3531_v36 }
 0x15a   : > { %3221 = vmatpush3.bf16.msra.mxu1 %v3541_v3 }
 0x15b   : > { %3222 = vmatprep.subr.bf16.mxu1 %v3750_v50 }
 0x15c   : > { %1156 = vmatpush1.bf16.msra.mxu0 %v3533_v37 }
 0x15d   : > { %1157 = vmatprep.subr.bf16.mxu0 %v3534_v38 }
 0x15e   : > { %3223 = vmatpush3.bf16.msra.mxu1 %v3542_v5 }
 0x15f   : > { %3224 = vmatprep.subr.bf16.mxu1 %v3750_v50 }
 0x160   : > { %1158 = vmatpush1.bf16.msra.mxu0 %v3536_v39 }
 0x162   : > { %3225 = vmatpush3.bf16.msra.mxu1 %v3543_v6 }
 0x163   : > { %1176 = vmatmul.mubr.bf16.vlgmr.msra.gmra.mrb[0].mxu0 %v965_v42  ;;  %3226 = vmatprep.subr.bf16.mxu1 %v3750_v50 }
 0x166   : > { %3227 = vmatpush3.bf16.msra.mxu1 %v3544_v7 }
 0x169   : > { %3229 = vmatmul.mubr.bf16.vlgmr.msra.gmra.mrb[0].mxu1 %v965_v42 }
 0x236   : > { %v1177_v51 = vpop.f32.mrb[0].mxu0 }
 0x237   : > { %v1178_v54 = vadd.f32 %v1177_v51, %v1003_v48  ;;  %v1179_v55 = vpop.f32.mrb[1].mxu0 }
 0x238   : > { %v1181_v56 = vpop.f32.mrb[2].mxu0  ;;  %v1180_v59 = vadd.f32 %v1179_v55, %v1007_v52 }
 0x239   : > { %v4085_v57 = vmul.f32 0.17677669, %v1178_v54  ;;  %v1183_v58 = vpop.f32.mrb[3].mxu0  ;;  %v1182_v2 = vadd.f32 %v1181_v56, %v1003_v48 }
 0x23a   : > { %v1184_v60 = vadd.f32 %v1183_v58, %v1007_v52 }
 0x23b   : > { %3236 = vmatprep.mubr.msk.f32.mxu0 %vm1229_vm3, %v4085_v57  ;;  %v4110_v4 = vmul.f32 0.17677669, %v1182_v2 }
 0x23c   : > { %v4097_v63 = vpack.i.bf16 %v1184_v60, %v1180_v59  ;;  %v3328_v0 = vpack.c.bf16 %v1184_v60, %v1180_v59  ;;  %v1220_v13 = vpop.f32.mrb[0].mxu1 }
 0x23d   : > { %v3230_v15 = vpop.f32.mrb[1].mxu1  ;;  %v4125_v17 = vadd.f32 %v1220_v13, %v1011_v14 }
 0x23e   : > { %3474 = vrot.lane.b32.xlu1 %v4097_v63, %s3752_s3  ;;  %3330 = vmatprep.subr.msk.bf16.mxu0 %vm4091_vm4, %v3328_v0  ;;  %v1223_v16 = vpop.f32.mrb[2].mxu1 }
 0x23f   : > { %3333 = vmatpush3.bf16.xpose.msk.msra.mxu0 %vm4091_vm4, %v3328_v0  ;;  %v4127_v18 = vadd.f32 %v1223_v16, %v1011_v14  ;;  %v3231_v19 = vpop.f32.mrb[3].mxu1 }
 0x241   : > { %v3334_v20 = vpack.c.bf16 %v4127_v18, %v4125_v17 }
 0x242   : > { %1426 = vrot.lane.b32.xlu1 %v4085_v57, %s3753_s28 }
 0x243   : > { %3336 = vmatprep.subr.msk.bf16.mxu0 %vm4132_vm9, %v3334_v20 }
 0x246   : > { %3237 = vmatmul.mubr.msk.f32.vlgmr.msra.gmra.mrb[4].mxu0 %vm1229_vm3, %v4110_v4 }
 0x247   : > { %3339 = vmatpush3.bf16.msk.msra.mxu0 %vm4132_vm9, %v3334_v20 }
 0x2b0   : > { %v3475_v37 = vpop.permute.xlu1 %3474 }
 0x2b1   : > { %v3477_v48 = vunpack.i.h.bf16 %v3475_v37  ;;  %v3476_v49 = vunpack.i.l.bf16 %v3475_v37 }
 0x2b3   : > { %v3352_v53 = vpack.c.bf16 %v3477_v48, %v3476_v49 }
 0x2b4   : > { %v1427_v38 = vpop.permute.xlu1 %1426 }
 0x319   : > { %v3238_v8 = vpop.f32.mrb[4].mxu0 }
 0x31a   : > { %v1308_v9 = vpop.f32.mrb[5].mxu0  ;;  %v1322_v11 = vsel %vm1321_vm6, %v3238_v8, -inf }
 0x31b   : > { %v1318_v10 = vsel %vm1317_vm5, %v1308_v9, -inf }
 0x31c   : > { %1319 = vmax.xlane.f32.xlu0 %v1318_v10 }
 0x320   : > { %1323 = vmax.xlane.f32.xlu0 %v1322_v11 }
 0x336   : > { %3469 = vrot.lane.b32.xlu0 %v4097_v63, %s3753_s28 }
 0x33a   : > { %1628 = vrot.lane.b32.xlu0 %v4085_v57, %s3752_s3 }
 0x3a9   : > { %v1320_v22 = vpop.xlane.xlu0 %1319 }
 0x3aa   : > { %v1325_v23 = vsub.f32 %v1308_v9, %v1320_v22 }
 0x3ac   : > { %v1327_v27 = vmul.f32 1.442695, %v1325_v23 }
 0x3ad   : > { %v1324_v24 = vpop.xlane.xlu0 %1323 }
 0x3ae   : > { %v1326_v26 = vsub.f32 %v3238_v8, %v1324_v24 }
 0x3b0   : > { %v1329_v28 = vmul.f32 1.442695, %v1326_v26 }
 0x3b1   : > { %v3470_v29 = vpop.permute.xlu0 %3469 }
 0x3b2   : > { %3593 = vpow2.f32 %v1329_v28  ;;  %v3472_v30 = vunpack.i.h.bf16 %v3470_v29  ;;  %v3471_v31 = vunpack.i.l.bf16 %v3470_v29 }
 0x3b3   : > { %3595 = vpow2.f32 %v1327_v27 }
 0x3b4   : > { %v3340_v32 = vpack.c.bf16 %v3472_v30, %v3471_v31 }
 0x3b5   : > { %v1629_v55 = vpop.permute.xlu0 %1628 }
 0x3b6   : > { %3342 = vmatprep.subr.msk.bf16.mxu0 %vm4091_vm4, %v3340_v32 }
 0x3bc   : > { %v3594_v33 = vpop.eup %3593 }
 0x3bd   : > { %v1334_v34 = vsel %vm1321_vm6, %v3594_v33, 0.0  ;;  %v3596_v35 = vpop.eup %3595 }
 0x3be   : > { %1335 = vadd.xlane.f32.xlu1 %v1334_v34  ;;  %v1331_v36 = vsel %vm1317_vm5, %v3596_v35, 0.0 }
 0x3c2   : > { %1332 = vadd.xlane.f32.xlu1 %v1331_v36 }
 0x3d3   : > { %1428 = vrot.lane.b32.xlu1 %v4110_v4, %s3753_s28 }
 0x3d7   : > { %1630 = vrot.lane.b32.xlu1 %v4110_v4, %s3752_s3 }
 0x44b   : > { %v1336_v39 = vpop.xlane.xlu1 %1335 }
 0x44c   : > { %3597 = vrcp.f32 %v1336_v39 }
 0x44f   : > { %v1333_v42 = vpop.xlane.xlu1 %1332 }
 0x450   : > { %3599 = vrcp.f32 %v1333_v42 }
 0x453   : > { %v1429_v54 = vpop.permute.xlu1 %1428 }
 0x456   : > { %v3598_v43 = vpop.eup %3597 }
 0x457   : > { %v1340_v52 = vmul.f32 %v3598_v43, %v3594_v33  ;;  %v1631_v56 = vpop.permute.xlu1 %1630 }
 0x45a   : > { %v3600_v46 = vpop.eup %3599 }
 0x45b   : > { %v1339_v51 = vmul.f32 %v3600_v46, %v3596_v35 }
 0x45d   : > { %3243 = vmatprep.mubr.msk.f32.mxu0 %vm1317_vm5, %v1339_v51 }
 0x45e   : > { %3244 = vmatmul.mubr.msk.f32.vlgmr.msra.gmra.mrb[6].mxu0 %vm1317_vm5, %v1340_v52 }
 0x45f   : > { %3345 = vmatpush3.bf16.xpose.msk.msra.mxu0 %vm4091_vm4, %v3340_v32  ;;  %3250 = vmatprep.mubr.msk.f32.mxu0 %vm1229_vm3, %v1427_v38 }
 0x460   : > { %3354 = vmatprep.subr.msk.bf16.mxu0 %vm4091_vm4, %v3352_v53 }
 0x466   : > { %3251 = vmatmul.mubr.msk.f32.vlgmr.msra.gmra.mrb[8].mxu0 %vm1229_vm3, %v1429_v54 }
 0x467   : > { %3357 = vmatpush3.bf16.xpose.msk.msra.mxu0 %vm4091_vm4, %v3352_v53  ;;  %3264 = vmatprep.mubr.msk.f32.mxu0 %vm1229_vm3, %v1629_v55 }
 0x46e   : > { %3265 = vmatmul.mubr.msk.f32.vlgmr.msra.gmra.mrb[10].mxu0 %vm1229_vm3, %v1631_v56 }
 0x531   : > { %v4164_v58 = vpop.f32.mrb[6].mxu0 }
 0x532   : > { %v4166_v59 = vpop.f32.mrb[7].mxu0 }
 0x539   : > { %v3252_v60 = vpop.f32.mrb[8].mxu0 }
 0x53a   : > { %v4168_v62 = vpop.f32.mrb[9].mxu0  ;;  %v1520_v5 = vsel %vm1321_vm6, %v3252_v60, -inf }
 0x53b   : > { %v1517_v23 = vsel %vm1317_vm5, %v4168_v62, -inf }
 0x541   : > { %v3266_v0 = vpop.f32.mrb[10].mxu0 }
 0x542   : > { %v1710_v1 = vpop.f32.mrb[11].mxu0  ;;  %v1722_v2 = vsel %vm1321_vm6, %v3266_v0, -inf }
 0x543   : > { %1723 = vmax.xlane.f32.xlu1 %v1722_v2  ;;  %v1719_v3 = vsel %vm1317_vm5, %v1710_v1, -inf }
 0x544   : > { %1720 = vmax.xlane.f32.xlu0 %v1719_v3 }
 0x554   : > { %3484 = vrot.lane.b32.xlu1 %v4097_v63, %s3755_s2 }
 0x558   : > { %1829 = vrot.lane.b32.xlu1 %v4085_v57, %s3755_s2 }
 0x55c   : > { %1831 = vrot.lane.b32.xlu1 %v4110_v4, %s3755_s2  ;;  %v4183_v4 = vpack.i.bf16 %v4127_v18, %v4125_v17 }
 0x580   : > { %1521 = vmax.xlane.f32.xlu1 %v1520_v5 }
 0x5d0   : > { %v1724_v6 = vpop.xlane.xlu1 %1723 }
 0x5d1   : > { %v1726_v7 = vsub.f32 %v3266_v0, %v1724_v6  ;;  %v1721_v8 = vpop.xlane.xlu0 %1720 }
 0x5d2   : > { %v1725_v9 = vsub.f32 %v1710_v1, %v1721_v8 }
 0x5d3   : > { %v1729_v10 = vmul.f32 1.442695, %v1726_v7 }
 0x5d4   : > { %v1727_v11 = vmul.f32 1.442695, %v1725_v9  ;;  %v3485_v14 = vpop.permute.xlu1 %3484 }
 0x5d5   : > { %3601 = vpow2.f32 %v1729_v10  ;;  %v3487_v28 = vunpack.i.h.bf16 %v3485_v14  ;;  %v3486_v29 = vunpack.i.l.bf16 %v3485_v14 }
 0x5d6   : > { %3603 = vpow2.f32 %v1727_v11 }
 0x5d7   : > { %v3364_v33 = vpack.c.bf16 %v3487_v28, %v3486_v29  ;;  %v3549_v28 = vld [vmem:[%s3956_s25 + $0x20] sm:$0xff]   ;;  %v3550_v29 = vld [vmem:[%s3956_s25 + $0x28] sm:$0xff]  }
 0x5d8   : > { %v1830_v15 = vpop.permute.xlu1 %1829 }
 0x5dc   : > { %v1832_v16 = vpop.permute.xlu1 %1831 }
 0x5df   : > { %v3602_v12 = vpop.eup %3601 }
 0x5e0   : > { %v1734_v63 = vsel %vm1321_vm6, %v3602_v12, 0.0  ;;  %v3604_v13 = vpop.eup %3603 }
 0x5e1   : > { %1735 = vadd.xlane.f32.xlu0 %v1734_v63  ;;  %v1731_v57 = vsel %vm1317_vm5, %v3604_v13, 0.0 }
 0x5e5   : > { %1732 = vadd.xlane.f32.xlu0 %v1731_v57 }
 0x5fb   : > { %3479 = vrot.lane.b32.xlu0 %v4183_v4, %s3752_s3 }
 0x60d   : > { %v1522_v19 = vpop.xlane.xlu1 %1521 }
 0x60e   : > { %v1524_v20 = vsub.f32 %v3252_v60, %v1522_v19 }
 0x610   : > { %v1527_v22 = vmul.f32 1.442695, %v1524_v20 }
 0x612   : > { %3605 = vpow2.f32 %v1527_v22 }
 0x61a   : > { %1518 = vmax.xlane.f32.xlu0 %v1517_v23 }
 0x61c   : > { %v4189_v24 = vpop.eup %3605 }
 0x61d   : > { %v1532_v17 = vsel %vm1321_vm6, %v4189_v24, 0.0 }
 0x61e   : > { %1533 = vadd.xlane.f32.xlu1 %v1532_v17 }
 0x66e   : > { %v1736_v18 = vpop.xlane.xlu0 %1735 }
 0x66f   : > { %3607 = vrcp.f32 %v1736_v18 }
 0x672   : > { %v1733_v26 = vpop.xlane.xlu0 %1732 }
 0x673   : > { %3609 = vrcp.f32 %v1733_v26  ;;  %v3546_v26 = vld [vmem:[%s3956_s25 + $0x8] sm:$0xff]  }
 0x676   : > { %v3480_v27 = vpop.permute.xlu0 %3479 }
 0x677   : > { %v3482_v30 = vunpack.i.h.bf16 %v3480_v27  ;;  %v3481_v31 = vunpack.i.l.bf16 %v3480_v27  ;;  %v3548_v27 = vld [vmem:[%s3956_s25 + $0x18] sm:$0xff]  }
 0x679   : > { %v3358_v32 = vpack.c.bf16 %v3482_v30, %v3481_v31  ;;  %v3608_v34 = vpop.eup %3607  ;;  %v3551_v30 = vld [vmem:[%s3956_s25 + $0x30] sm:$0xff]   ;;  %v3552_v31 = vld [vmem:[%s3956_s25 + $0x38] sm:$0xff]  }
 0x67a   : > { %v1740_v37 = vmul.f32 %v3608_v34, %v3602_v12 }
 0x67b   : > { %3360 = vmatprep.subr.msk.bf16.mxu0 %vm4132_vm9, %v3358_v32 }
 0x67c   : > { %3363 = vmatpush3.bf16.msk.msra.mxu0 %vm4132_vm9, %v3358_v32 }
 0x67d   : > { %v3610_v35 = vpop.eup %3609  ;;  %3366 = vmatprep.subr.msk.bf16.mxu0 %vm4091_vm4, %v3364_v33 }
 0x67e   : > { %v1739_v36 = vmul.f32 %v3610_v35, %v3604_v13 }
 0x680   : > { %3271 = vmatprep.mubr.msk.f32.mxu0 %vm1317_vm5, %v1739_v36 }
 0x681   : > { %3272 = vmatmul.mubr.msk.f32.vlgmr.msra.gmra.mrb[12].mxu0 %vm1317_vm5, %v1740_v37 }
 0x682   : > { %3278 = vmatprep.mubr.msk.f32.mxu0 %vm1229_vm3, %v1830_v15 }
 0x685   : > { %3369 = vmatpush3.bf16.xpose.msk.msra.mxu0 %vm4091_vm4, %v3364_v33 }
 0x68c   : > { %3279 = vmatmul.mubr.msk.f32.vlgmr.msra.gmra.mrb[14].mxu0 %vm1229_vm3, %v1832_v16 }
 0x68d   : > { %2361 = vmatprep.mubr.bf16.mxu0 %v3749_v25 }
 0x6a7   : > { %v1519_v38 = vpop.xlane.xlu0 %1518 }
 0x6a8   : > { %v1523_v39 = vsub.f32 %v4168_v62, %v1519_v38 }
 0x6aa   : > { %v1525_v48 = vmul.f32 1.442695, %v1523_v39 }
 0x6ab   : > { %v1534_v9 = vpop.xlane.xlu1 %1533 }
 0x6ac   : > { %3611 = vpow2.f32 %v1525_v48 }
 0x6b6   : > { %v3612_v25 = vpop.eup %3611 }
 0x6b7   : > { %v1529_v53 = vsel %vm1317_vm5, %v3612_v25, 0.0 }
 0x754   : > { %v4207_v42 = vpop.f32.mrb[12].mxu0 }
 0x755   : > { %v4209_v43 = vpop.f32.mrb[13].mxu0 }
 0x756   : > { %v3503_v46 = vpack.i.bf16 %v4207_v42, %v4209_v43 }
 0x75f   : > { %v3280_v49 = vpop.f32.mrb[14].mxu0 }
 0x760   : > { %v1911_v51 = vpop.f32.mrb[15].mxu0  ;;  %v1923_v52 = vsel %vm1321_vm6, %v3280_v49, -inf }
 0x761   : > { %v1920_v61 = vsel %vm1317_vm5, %v1911_v51, -inf }
 0x762   : > { %1921 = vmax.xlane.f32.xlu0 %v1920_v61 }
 0x766   : > { %1924 = vmax.xlane.f32.xlu0 %v1923_v52 }
 0x76a   : > { %1530 = vadd.xlane.f32.xlu0 %v1529_v53 }
 0x7ef   : > { %v1922_v54 = vpop.xlane.xlu0 %1921 }
 0x7f0   : > { %v1926_v55 = vsub.f32 %v1911_v51, %v1922_v54 }
 0x7f2   : > { %v1928_v56 = vmul.f32 1.442695, %v1926_v55 }
 0x7f3   : > { %v1925_v60 = vpop.xlane.xlu0 %1924 }
 0x7f4   : > { %3613 = vpow2.f32 %v1928_v56  ;;  %v1927_v62 = vsub.f32 %v3280_v49, %v1925_v60  ;;  %v3041_v60 = vld [vmem:[%s4515_s23] ss:$0 sm:$0xff] }
 0x7f6   : > { %v1930_v0 = vmul.f32 1.442695, %v1927_v62 }
 0x7f7   : > { %v1531_v1 = vpop.xlane.xlu0 %1530 }
 0x7f8   : > { %3615 = vpow2.f32 %v1930_v0 }
 0x7f9   : > { %3617 = vrcp.f32 %v1531_v1 }
 0x7fa   : > { %3619 = vrcp.f32 %v1534_v9  ;;  %v3558_v9 = vld [vmem:[%s3980_s29 + $0x14] ss:$8 sps:$4 sm:$0xff]  }
 0x7fe   : > { %v3614_v2 = vpop.eup %3613 }
 0x7ff   : > { %v1932_v3 = vsel %vm1317_vm5, %v3614_v2, 0.0 }
 0x800   : > { %1933 = vadd.xlane.f32.xlu0 %v1932_v3 }
 0x802   : > { %v3616_v5 = vpop.eup %3615 }
 0x803   : > { %v3618_v6 = vpop.eup %3617  ;;  %v1935_v7 = vsel %vm1321_vm6, %v3616_v5, 0.0 }
 0x804   : > { %1936 = vadd.xlane.f32.xlu1 %v1935_v7  ;;  %v1537_v8 = vmul.f32 %v3618_v6, %v3612_v25  ;;  %v3620_v14 = vpop.eup %3619  ;;  %v3553_v7 = vld [vmem:[%s3980_s29] ss:$8 sps:$4 sm:$0xff]  }
 0x805   : > { %v1538_v20 = vmul.f32 %v3620_v14, %v4189_v24  ;;  %v3545_v24 = vld [vmem:[%s3956_s25] sm:$0xff]  }
 0x806   : > { %3257 = vmatprep.mubr.msk.f32.mxu1 %vm1317_vm5, %v1537_v8  ;;  %v3555_v8 = vld [vmem:[%s3980_s29 + $0x4] ss:$8 sps:$4 sm:$0xff]  }
 0x807   : > { %2329 = vmatprep.subr.bf16.mxu0 %v3555_v8 }
 0x808   : > { %2330 = vmatpush1.bf16.msra.mxu0 %v3553_v7 }
 0x809   : > { %2331 = vmatprep.subr.bf16.mxu0 %v3558_v9 }
 0x815   : > { %3494 = vrot.lane.b32.xlu1 %v4183_v4, %s3755_s2 }
 0x816   : > { %3489 = vrot.lane.b32.xlu0 %v4183_v4, %s3753_s28 }
 0x88d   : > { %v1934_v10 = vpop.xlane.xlu0 %1933 }
 0x88e   : > { %3621 = vrcp.f32 %v1934_v10  ;;  %v3556_v10 = vld [vmem:[%s3980_s29 + $0x10] ss:$8 sps:$4 sm:$0xff]  }
 0x88f   : > { %2332 = vmatpush1.bf16.msra.mxu0 %v3556_v10 }
 0x891   : > { %v1937_v11 = vpop.xlane.xlu1 %1936  ;;  %v3490_v12 = vpop.permute.xlu0 %3489 }
 0x892   : > { %3623 = vrcp.f32 %v1937_v11  ;;  %v3492_v63 = vunpack.i.h.bf16 %v3490_v12  ;;  %v3491_v13 = vunpack.i.l.bf16 %v3490_v12 }
 0x894   : > { %v3346_v57 = vpack.c.bf16 %v3492_v63, %v3491_v13 }
 0x895   : > { %v3495_v15 = vpop.permute.xlu1 %3494 }
 0x896   : > { %v3497_v16 = vunpack.i.h.bf16 %v3495_v15  ;;  %v3496_v19 = vunpack.i.l.bf16 %v3495_v15  ;;  %3348 = vmatprep.subr.msk.bf16.mxu1 %vm4132_vm9, %v3346_v57 }
 0x897   : > { %3351 = vmatpush3.bf16.msk.msra.mxu1 %vm4132_vm9, %v3346_v57 }
 0x898   : > { %v3622_v4 = vpop.eup %3621  ;;  %v3370_v22 = vpack.c.bf16 %v3497_v16, %v3496_v19  ;;  %v3561_v16 = vld [vmem:[%s3980_s29 + $0x24] ss:$8 sps:$4 sm:$0xff]   ;;  %v3559_v19 = vld [vmem:[%s3980_s29 + $0x20] ss:$8 sps:$4 sm:$0xff]  }
 0x899   : > { %v1940_v23 = vmul.f32 %v3622_v4, %v3614_v2  ;;  %2333 = vmatprep.subr.bf16.mxu0 %v3561_v16  ;;  %v3564_v4 = vld [vmem:[%s3980_s29 + $0x34] ss:$8 sps:$4 sm:$0xff]  }
 0x89a   : > { %3258 = vmatmul.mubr.msk.f32.vlgmr.msra.gmra.mrb[4].mxu1 %vm1317_vm5, %v1538_v20  ;;  %3372 = vmatprep.subr.msk.bf16.mxu1 %vm4132_vm9, %v3370_v22  ;;  %v3562_v20 = vld [vmem:[%s3980_s29 + $0x30] ss:$8 sps:$4 sm:$0xff]  }
 0x89b   : > { %3375 = vmatpush3.bf16.msk.msra.mxu1 %vm4132_vm9, %v3370_v22  ;;  %3285 = vmatprep.mubr.msk.f32.mxu1 %vm1317_vm5, %v1940_v23  ;;  %v3567_v22 = vld [vmem:[%s3980_s29 + $0x44] ss:$8 sps:$4 sm:$0xff]   ;;  %v3565_v23 = vld [vmem:[%s3980_s29 + $0x40] ss:$8 sps:$4 sm:$0xff]  }
 0x89c   : > { %v3624_v17 = vpop.eup %3623  ;;  %3288 = vmatprep.subr.bf16.mxu1 %v3750_v50  ;;  %2334 = vmatpush1.bf16.msra.mxu0 %v3559_v19 }
 0x89d   : > { %v1941_v18 = vmul.f32 %v3624_v17, %v3616_v5  ;;  %2335 = vmatprep.subr.bf16.mxu0 %v3564_v4  ;;  %v3570_v17 = vld [vmem:[%s3980_s29 + $0x54] ss:$8 sps:$4 sm:$0xff]  }
 0x89f   : > { %3286 = vmatmul.mubr.msk.f32.vlgmr.msra.gmra.mrb[6].mxu1 %vm1317_vm5, %v1941_v18  ;;  %v3568_v18 = vld [vmem:[%s3980_s29 + $0x50] ss:$8 sps:$4 sm:$0xff]  }
 0x8a0   : > { %3304 = vmatprep.mubr.msk.bf16.mxu1 %vm3751_vm2, %v3750_v50  ;;  %3289 = vmatpush3.bf16.msra.mxu1 %v3545_v24  ;;  %v3573_v24 = vld [vmem:[%s3980_s29 + $0x64] ss:$8 sps:$4 sm:$0xff]  }
 0x8a1   : > { %3290 = vmatprep.subr.bf16.mxu1 %v3750_v50  ;;  %2336 = vmatpush1.bf16.msra.mxu0 %v3562_v20 }
 0x8a2   : > { %2337 = vmatprep.subr.bf16.mxu0 %v3567_v22 }
 0x8a4   : > { %3291 = vmatpush3.bf16.msra.mxu1 %v3546_v26  ;;  %v3571_v26 = vld [vmem:[%s3980_s29 + $0x60] ss:$8 sps:$4 sm:$0xff]  }
 0x8a5   : > { %3292 = vmatprep.subr.bf16.mxu1 %v3750_v50  ;;  %2338 = vmatpush1.bf16.msra.mxu0 %v3565_v23 }
 0x8a6   : > { %2339 = vmatprep.subr.bf16.mxu0 %v3570_v17 }
 0x8a8   : > { %3293 = vmatpush3.bf16.msra.mxu1 %v3547_v21  ;;  %v3576_v21 = vld [vmem:[%s3980_s29 + $0x74] ss:$8 sps:$4 sm:$0xff]  }
 0x8a9   : > { %3294 = vmatprep.subr.bf16.mxu1 %v3750_v50  ;;  %2340 = vmatpush1.bf16.msra.mxu0 %v3568_v18 }
 0x8aa   : > { %2341 = vmatprep.subr.bf16.mxu0 %v3573_v24 }
 0x8ac   : > { %3295 = vmatpush3.bf16.msra.mxu1 %v3548_v27  ;;  %v3574_v27 = vld [vmem:[%s3980_s29 + $0x70] ss:$8 sps:$4 sm:$0xff]   ;;  %s4516_s29 = scalar_lea.vmem %s4443_s8, %s3938_s1 }
 0x8ad   : > { %3296 = vmatprep.subr.bf16.mxu1 %v3750_v50  ;;  %2342 = vmatpush1.bf16.msra.mxu0 %v3571_v26 }
 0x8ae   : > { %2343 = vmatprep.subr.bf16.mxu0 %v3576_v21 }
 0x8b0   : > { %3297 = vmatpush3.bf16.msra.mxu1 %v3549_v28 }
 0x8b1   : > { %3298 = vmatprep.subr.bf16.mxu1 %v3750_v50  ;;  %2344 = vmatpush1.bf16.msra.mxu0 %v3574_v27 }
 0x8b4   : > { %3299 = vmatpush3.bf16.msra.mxu1 %v3550_v29 }
 0x8b5   : > { %3300 = vmatprep.subr.bf16.mxu1 %v3750_v50 }
 0x8b8   : > { %3301 = vmatpush3.bf16.msra.mxu1 %v3551_v30 }
 0x8b9   : > { %3302 = vmatprep.subr.bf16.mxu1 %v3750_v50 }
 0x8bc   : > { %3303 = vmatpush3.bf16.msra.mxu1 %v3552_v31 }
 0x96d   : > { %v3259_v32 = vpop.f32.mrb[4].mxu1 }
 0x96e   : > { %v1619_v33 = vpop.f32.mrb[5].mxu1 }
 0x96f   : > { %v3498_v34 = vpack.i.bf16 %v3259_v32, %v1619_v33 }
 0x971   : > { %3499 = vrot.lane.b32.xlu1 %v3498_v34, %s3755_s2  ;;  %s4518_s2 = sld [smem:[#allocation8_spill]] }
 0x972   : > { %v3287_v35 = vpop.f32.mrb[6].mxu1 }
 0x973   : > { %v2021_v36 = vpop.f32.mrb[7].mxu1 }
 0x974   : > { %v3508_v37 = vpack.i.bf16 %v3287_v35, %v2021_v36  ;;  %v3050_v36 = vld [vmem:[%s4516_s29] ss:$0 sm:$0xff] }
 0x975   : > { %3504 = vrot.lane.b32.xlu1 %v3503_v46, %s3752_s3 }
 0x976   : > { %3509 = vrot.lane.b32.xlu0 %v3508_v37, %s3753_s28 }
 0x977   : > { %p3087_p1 = scmp.ne.s32.totalorder %s4518_s2, 1 }
 0x978   : > { %s4519_s0 = sld [smem:[#allocation29_spill]] (!%p3087_p1)  ;;  %vm3757_vm12 = vmmov (!%p3087_p1), 0   ;;  %s4521_s1 = sld [smem:[#allocation28_spill]] (!%p3087_p1) }
 0x979   : > { %s4522_s18 = sld [smem:[#allocation30_spill]] (!%p3087_p1) }
 0x9e3   : > { %v3500_v38 = vpop.permute.xlu1 %3499 }
 0x9e4   : > { %v3502_v39 = vunpack.i.h.bf16 %v3500_v38  ;;  %v3501_v50 = vunpack.i.l.bf16 %v3500_v38 }
 0x9e6   : > { %v2055_v52 = vsel %vm1229_vm3, %v4164_v58, %v3502_v39  ;;  %v2054_v25 = vsel %vm1229_vm3, %v4166_v59, %v3501_v50  ;;  %v3051_v50 = vld [vmem:[%s4517_s5] ss:$0 sm:$0xff] }
 0x9e7   : > { %v3505_v48 = vpop.permute.xlu1 %3504 }
 0x9e8   : > { %v3507_v49 = vunpack.i.h.bf16 %v3505_v48  ;;  %v3506_v51 = vunpack.i.l.bf16 %v3505_v48  ;;  %v3510_v61 = vpop.permute.xlu0 %3509 }
 0x9e9   : > { %v3512_v42 = vunpack.i.h.bf16 %v3510_v61  ;;  %v3511_v43 = vunpack.i.l.bf16 %v3510_v61 }
 0x9ea   : > { %v2057_v46 = vsel %vm2056_vm10, %v2054_v25, %v3506_v51  ;;  %v2058_v53 = vsel %vm2056_vm10, %v2055_v52, %v3507_v49  ;;  %v3577_v52 = vld [vmem:[%s3990_s24 + $0x40] sm:$0xff]  }
 0x9eb   : > { %v2061_v54 = vsel %vm2059_vm11, %v2058_v53, %v3512_v42  ;;  %v2060_v55 = vsel %vm2059_vm11, %v2057_v46, %v3511_v43  ;;  %v3578_v25 = vld [vmem:[%s3990_s24] sm:$0xff]   ;;  %3161 = vmatprep.subr.bf16.mxu1 %v3577_v52  ;;  %v3579_v42 = vld [vmem:[%s3990_s24 + $0x48] sm:$0xff]   ;;  %v3581_v46 = vld [vmem:[%s3990_s24 + $0x50] sm:$0xff]  }
 0x9ec   : > { %v2062_v56 = vpack.c.bf16 %v2061_v54, %v2060_v55  ;;  %v3580_v43 = vld [vmem:[%s3990_s24 + $0x8] sm:$0xff]   ;;  %v3582_v53 = vld [vmem:[%s3990_s24 + $0x10] sm:$0xff]   ;;  %v3583_v54 = vld [vmem:[%s3990_s24 + $0x58] sm:$0xff]  }
 0x9ed   : > { %v3584_v55 = vld [vmem:[%s3990_s24 + $0x18] sm:$0xff]  }
 0x9ee   : > { %3305 = vmatmul.mubr.bf16.vlgmr.msra.gmra.mrb[8].mxu1 %v2062_v56  ;;  %v3585_v56 = vld [vmem:[%s3990_s24 + $0x60] sm:$0xff]  }
 0x9ef   : > { %3162 = vmatpush3.bf16.msra.mxu1 %v3578_v25 }
 0x9f0   : > { %3163 = vmatprep.subr.bf16.mxu1 %v3579_v42 }
 0x9f3   : > { %3164 = vmatpush3.bf16.msra.mxu1 %v3580_v43 }
 0x9f4   : > { %3165 = vmatprep.subr.bf16.mxu1 %v3581_v46  ;;  %v3068_v46 = vld [vmem:[%s827_s30] ss:$0 sm:$0xff] }
 0x9f7   : > { %3166 = vmatpush3.bf16.msra.mxu1 %v3582_v53 }
 0x9f8   : > { %3167 = vmatprep.subr.bf16.mxu1 %v3583_v54 }
 0x9fb   : > { %3168 = vmatpush3.bf16.msra.mxu1 %v3584_v55 }
 0x9fc   : > { %3169 = vmatprep.subr.bf16.mxu1 %v3585_v56 }
 0xac1   : > { %v2168_v58 = vpop.f32.mrb[8].mxu1 }
 0xac2   : > { %v2169_v62 = vadd.f32 %v3041_v60, %v2168_v58  ;;  %v3306_v59 = vpop.f32.mrb[9].mxu1  ;;  %v3587_v58 = vld [vmem:[%s3990_s24 + $0x68] sm:$0xff]  }
 0xac3   : > { %v2171_v0 = vpop.f32.mrb[10].mxu1  ;;  %v3589_v59 = vld [vmem:[%s3990_s24 + $0x70] sm:$0xff]  }
 0xac4   : > { %v2172_v1 = vadd.f32 %v3041_v60, %v2171_v0  ;;  %v3307_v2 = vpop.f32.mrb[11].mxu1  ;;  %v2175_v3 = vadd.f32 %v2169_v62, %v4060_v40  ;;  %v3586_v60 = vld [vmem:[%s3990_s24 + $0x20] sm:$0xff]   ;;  %v3588_v62 = vld [vmem:[%s3990_s24 + $0x28] sm:$0xff]   ;;  %v3590_v0 = vld [vmem:[%s3990_s24 + $0x30] sm:$0xff]  }
 0xac5   : > { %3170 = vmatpush3.bf16.msra.mxu1 %v3586_v60  ;;  %v3592_v2 = vld [vmem:[%s3990_s24 + $0x38] sm:$0xff]  }
 0xac6   : > { %2177 = vadd.xlane.f32.xlu0 %v2175_v3  ;;  %v2176_v5 = vadd.f32 %v2172_v1, %v4062_v41  ;;  %3171 = vmatprep.subr.bf16.mxu1 %v3587_v58  ;;  %v3591_v1 = vld [vmem:[%s3990_s24 + $0x78] sm:$0xff]  }
 0xac8   : > { %v2179_v6 = vsel %vm1347_vm7, %v2176_v5, 0.0 }
 0xac9   : > { %2180 = vadd.xlane.f32.xlu1 %v2179_v6  ;;  %3172 = vmatpush3.bf16.msra.mxu1 %v3588_v62 }
 0xaca   : > { %3173 = vmatprep.subr.bf16.mxu1 %v3589_v59 }
 0xacd   : > { %3174 = vmatpush3.bf16.msra.mxu1 %v3590_v0 }
 0xace   : > { %3175 = vmatprep.subr.bf16.mxu1 %v3591_v1 }
 0xad1   : > { %3176 = vmatpush3.bf16.msra.mxu1 %v3592_v2 }
 0xb53   : > { %v2178_v11 = vpop.xlane.xlu0 %2177 }
 0xb54   : > { %v2183_v40 = vmul.f32 0.0078125, %v2178_v11 }
 0xb56   : > { %v2185_v12 = vsub.f32 %v2175_v3, %v2183_v40  ;;  %v2181_v63 = vpop.xlane.xlu1 %2180  ;;  %v2237_v3 = vld [vmem:[%s3985_s16] sm:$0x3] }
 0xb57   : > { %v2184_v41 = vmul.f32 0.0078125, %v2181_v63  ;;  %v2246_v6 = vrot.slane %v2237_v3, %v1006_v47 }
 0xb58   : > { %v2187_v13 = vmul.f32 %v2185_v12, %v2185_v12 }
 0xb59   : > { %v2186_v57 = vsub.f32 %v2176_v5, %v2184_v41  ;;  %v2242_v5 = vrot.slane %v2237_v3, %v1002_v45 }
 0xb5a   : > { %2189 = vadd.xlane.f32.xlu0 %v2187_v13 }
 0xb5b   : > { %v2188_v14 = vmul.f32 %v2186_v57, %v2186_v57 }
 0xb5d   : > { %v2191_v15 = vsel %vm1347_vm7, %v2188_v14, 0.0 }
 0xb5e   : > { %2192 = vadd.xlane.f32.xlu0 %v2191_v15 }
 0xbe7   : > { %v2190_v28 = vpop.xlane.xlu0 %2189 }
 0xbe8   : > { %v2194_v29 = vmul.f32 0.0078125, %v2190_v28 }
 0xbea   : > { %v2196_v30 = vadd.f32 1e-05, %v2194_v29 }
 0xbeb   : > { %v2193_v31 = vpop.xlane.xlu0 %2192 }
 0xbec   : > { %3625 = vrsqrt.f32 %v2196_v30  ;;  %v2195_v32 = vmul.f32 0.0078125, %v2193_v31 }
 0xbee   : > { %v2197_v33 = vadd.f32 1e-05, %v2195_v32 }
 0xbf0   : > { %3627 = vrsqrt.f32 %v2197_v33 }
 0xbf6   : > { %v3626_v34 = vpop.eup %3625 }
 0xbf7   : > { %v2200_v35 = vmul.f32 %v3626_v34, %v2185_v12 }
 0xbf9   : > { %v2209_v39 = vmul.f32 %v3050_v36, %v2200_v35 }
 0xbfa   : > { %v3628_v37 = vpop.eup %3627 }
 0xbfb   : > { %v2201_v38 = vmul.f32 %v3628_v37, %v2186_v57  ;;  %v4298_v49 = vadd.f32 %v3051_v50, %v2209_v39 }
 0xbfd   : > { %v2210_v48 = vmul.f32 %v3050_v36, %v2201_v38 }
 0xbff   : > { %v4300_v51 = vadd.f32 %v3051_v50, %v2210_v48 }
 0xc01   : > { %v2220_v61 = vpack.c.bf16 %v4300_v51, %v4298_v49 }
 0xc03   : > { %2362 = vmatmul.mubr.bf16.vlgmr.msra.gmra.mrb[16].mxu0 %v2220_v61 }
 0xcd6   : > { %v2363_v7 = vpop.f32.mrb[16].mxu0 }
 0xcd7   : > { %v2364_v8 = vadd.f32 %v2363_v7, %v2242_v5  ;;  %v2365_v9 = vpop.f32.mrb[17].mxu0 }
 0xcd8   : > { %v2366_v10 = vadd.f32 %v2365_v9, %v2246_v6  ;;  %v2367_v11 = vpop.f32.mrb[18].mxu0 }
 0xcd9   : > { %v2376_v40 = vmul.f32 0.044715, %v2364_v8  ;;  %v2368_v12 = vadd.f32 %v2367_v11, %v2242_v5  ;;  %v2369_v63 = vpop.f32.mrb[19].mxu0  ;;  %v2372_v34 = vmul.f32 0.5, %v2364_v8 }
 0xcda   : > { %v2377_v41 = vmul.f32 0.044715, %v2366_v10  ;;  %v2370_v13 = vadd.f32 %v2369_v63, %v2246_v6  ;;  %v2373_v37 = vmul.f32 0.5, %v2366_v10 }
 0xcdb   : > { %v2380_v57 = vmul.f32 %v2376_v40, %v2364_v8  ;;  %v2378_v14 = vmul.f32 0.044715, %v2368_v12  ;;  %v2374_v35 = vmul.f32 0.5, %v2368_v12 }
 0xcdc   : > { %v2381_v15 = vmul.f32 %v2377_v41, %v2366_v10  ;;  %v2379_v16 = vmul.f32 0.044715, %v2370_v13  ;;  %v2375_v38 = vmul.f32 0.5, %v2370_v13 }
 0xcdd   : > { %v2384_v19 = vmul.f32 %v2380_v57, %v2364_v8  ;;  %v2382_v4 = vmul.f32 %v2378_v14, %v2368_v12  ;;  %v3085_v57 = vld [vmem:[%s830_s6] ss:$0 sm:$0xff]  ;;  %s4520_s6 = sld [smem:[#allocation27_spill]] (!%p3087_p1) }
 0xcde   : > { %v2385_v45 = vmul.f32 %v2381_v15, %v2366_v10  ;;  %v2383_v20 = vmul.f32 %v2379_v16, %v2370_v13  ;;  %v3086_v15 = vld [vmem:[%s833_s10] ss:$0 sm:$0xff] }
 0xcdf   : > { %v2388_v44 = vadd.f32 %v2384_v19, %v2364_v8  ;;  %v2386_v47 = vmul.f32 %v2382_v4, %v2368_v12 }
 0xce0   : > { %v2387_v22 = vmul.f32 %v2383_v20, %v2370_v13  ;;  %v2389_v23 = vadd.f32 %v2385_v45, %v2366_v10 }
 0xce1   : > { %v2392_v17 = vmul.f32 0.7978846, %v2388_v44  ;;  %v2390_v18 = vadd.f32 %v2386_v47, %v2368_v12 }
 0xce2   : > { %v2391_v24 = vadd.f32 %v2387_v22, %v2370_v13  ;;  %v2393_v26 = vmul.f32 0.7978846, %v2389_v23  ;;  %v3641_v22 = vld [vmem:[%s4519_s0] sm:$0xff] (!%p3087_p1)   ;;  %v3756_v23 = vmov (!%p3087_p1), 0.0  }
 0xce3   : > { %3629 = vtanh.f32 %v2392_v17  ;;  %v2394_v21 = vmul.f32 0.7978846, %v2390_v18  ;;  %3308 = vmatprep.subr.bf16.mxu0 (!%p3087_p1), %v3756_v23  ;;  %v3642_v17 = vld [vmem:[%s4519_s0 + $0x8] sm:$0xff] (!%p3087_p1)   ;;  %3324 = vmatprep.mubr.msk.bf16.mxu0 (!%p3087_p1), %vm3757_vm12, %v3756_v23 }
 0xce4   : > { %v2395_v27 = vmul.f32 0.7978846, %v2391_v24  ;;  %3631 = vtanh.f32 %v2393_v26  ;;  %3309 = vmatpush3.bf16.msra.mxu0 (!%p3087_p1), %v3641_v22 }
 0xce5   : > { %3633 = vtanh.f32 %v2394_v21  ;;  %3310 = vmatprep.subr.bf16.mxu0 (!%p3087_p1), %v3756_v23 }
 0xce6   : > { %3635 = vtanh.f32 %v2395_v27 }
 0xce8   : > { %3311 = vmatpush3.bf16.msra.mxu0 (!%p3087_p1), %v3642_v17 }
 0xce9   : > { %3312 = vmatprep.subr.bf16.mxu0 (!%p3087_p1), %v3756_v23 }
 0xced   : > { %v3630_v28 = vpop.eup %3629 }
 0xcee   : > { %v3632_v29 = vpop.eup %3631  ;;  %v2400_v30 = vadd.f32 1.0, %v3630_v28  ;;  %v3643_v28 = vld [vmem:[%s4519_s0 + $0x10] sm:$0xff] (!%p3087_p1)  }
 0xcef   : > { %v3634_v31 = vpop.eup %3633  ;;  %v2401_v32 = vadd.f32 1.0, %v3632_v29  ;;  %3313 = vmatpush3.bf16.msra.mxu0 (!%p3087_p1), %v3643_v28  ;;  %v3644_v29 = vld [vmem:[%s4519_s0 + $0x18] sm:$0xff] (!%p3087_p1)  }
 0xcf0   : > { %v3636_v33 = vpop.eup %3635  ;;  %v2402_v36 = vadd.f32 1.0, %v3634_v31  ;;  %v2404_v50 = vmul.f32 %v2400_v30, %v2372_v34  ;;  %3314 = vmatprep.subr.bf16.mxu0 (!%p3087_p1), %v3756_v23  ;;  %v3645_v30 = vld [vmem:[%s4519_s0 + $0x20] sm:$0xff] (!%p3087_p1)   ;;  %v3646_v31 = vld [vmem:[%s4519_s0 + $0x28] sm:$0xff] (!%p3087_p1)  }
 0xcf1   : > { %v2403_v39 = vadd.f32 1.0, %v3636_v33  ;;  %v2405_v61 = vmul.f32 %v2401_v32, %v2373_v37  ;;  %v3647_v32 = vld [vmem:[%s4519_s0 + $0x30] sm:$0xff] (!%p3087_p1)   ;;  %v3648_v33 = vld [vmem:[%s4519_s0 + $0x38] sm:$0xff] (!%p3087_p1)  }
 0xcf2   : > { %v2406_v48 = vmul.f32 %v2402_v36, %v2374_v35 }
 0xcf3   : > { %v2407_v52 = vmul.f32 %v2403_v39, %v2375_v38  ;;  %3315 = vmatpush3.bf16.msra.mxu0 (!%p3087_p1), %v3644_v29  ;;  %v2649_v38 = vld [vmem:[%s4520_s6] sm:$0x1] (!%p3087_p1) }
 0xcf4   : > { %v2408_v25 = vpack.c.bf16 %v2406_v48, %v2404_v50  ;;  %3316 = vmatprep.subr.bf16.mxu0 (!%p3087_p1), %v3756_v23  ;;  %v2651_v50 = vld [vmem:[%s4521_s1] sm:$0x1] (!%p3087_p1) }
 0xcf5   : > { %v2409_v42 = vpack.c.bf16 %v2407_v52, %v2405_v61 }
 0xcf7   : > { %2577 = vmatprep.mubr.bf16.mxu1 %v2409_v42  ;;  %3317 = vmatpush3.bf16.msra.mxu0 (!%p3087_p1), %v3645_v30 }
 0xcf8   : > { %2578 = vmatmul.mubr.bf16.vlgmr.msra.gmra.mrb[12].mxu1 %v2408_v25  ;;  %3318 = vmatprep.subr.bf16.mxu0 (!%p3087_p1), %v3756_v23  ;;  %v2670_v25 = vld [vmem:[%s4522_s18] sm:$0x1] (!%p3087_p1) }
 0xcfb   : > { %3319 = vmatpush3.bf16.msra.mxu0 (!%p3087_p1), %v3646_v31 }
 0xcfc   : > { %3320 = vmatprep.subr.bf16.mxu0 (!%p3087_p1), %v3756_v23 }
 0xcff   : > { %3321 = vmatpush3.bf16.msra.mxu0 (!%p3087_p1), %v3647_v32 }
 0xd00   : > { %3322 = vmatprep.subr.bf16.mxu0 (!%p3087_p1), %v3756_v23 }
 0xd03   : > { %3323 = vmatpush3.bf16.msra.mxu0 (!%p3087_p1), %v3648_v33 }
 0xdcb   : > { %v3177_v43 = vpop.f32.mrb[12].mxu1 }
 0xdcc   : > { %v3178_v53 = vpop.f32.mrb[13].mxu1 }
 0xdcd   : > { %v3179_v54 = vadd.f32 %v3178_v53, %v3177_v43  ;;  %v3180_v55 = vpop.f32.mrb[14].mxu1 }
 0xdce   : > { %v3181_v56 = vpop.f32.mrb[15].mxu1 }
 0xdcf   : > { %v2580_v60 = vadd.f32 %v3179_v54, %v3068_v46  ;;  %v3182_v58 = vadd.f32 %v3181_v56, %v3180_v55 }
 0xdd1   : > { %v2583_v62 = vadd.f32 %v3182_v58, %v3068_v46  ;;  %v2586_v59 = vadd.f32 %v2580_v60, %v4298_v49 }
 0xdd3   : > { %2588 = vadd.xlane.f32.xlu0 %v2586_v59  ;;  %v2587_v0 = vadd.f32 %v2583_v62, %v4300_v51 }
 0xdd5   : > { %v2590_v1 = vsel %vm1347_vm7, %v2587_v0, 0.0 }
 0xdd6   : > { %2591 = vadd.xlane.f32.xlu1 %v2590_v1 }
 0xe60   : > { %v2589_v2 = vpop.xlane.xlu0 %2588 }
 0xe61   : > { %v2593_v3 = vmul.f32 0.0078125, %v2589_v2 }
 0xe63   : > { %v2595_v5 = vsub.f32 %v2586_v59, %v2593_v3  ;;  %v2592_v6 = vpop.xlane.xlu1 %2591 }
 0xe64   : > { %v2594_v7 = vmul.f32 0.0078125, %v2592_v6 }
 0xe65   : > { %v2597_v8 = vmul.f32 %v2595_v5, %v2595_v5 }
 0xe66   : > { %v2596_v9 = vsub.f32 %v2587_v0, %v2594_v7 }
 0xe67   : > { %2599 = vadd.xlane.f32.xlu1 %v2597_v8 }
 0xe68   : > { %v2598_v10 = vmul.f32 %v2596_v9, %v2596_v9 }
 0xe6a   : > { %v2601_v11 = vsel %vm1347_vm7, %v2598_v10, 0.0 }
 0xe6b   : > { %2602 = vadd.xlane.f32.xlu0 %v2601_v11 }
 0xef4   : > { %v2600_v49 = vpop.xlane.xlu1 %2599 }
 0xef5   : > { %v2604_v40 = vmul.f32 0.0078125, %v2600_v49 }
 0xef7   : > { %v2606_v51 = vadd.f32 1e-05, %v2604_v40 }
 0xef8   : > { %v2603_v12 = vpop.xlane.xlu0 %2602 }
 0xef9   : > { %3637 = vrsqrt.f32 %v2606_v51  ;;  %v2605_v63 = vmul.f32 0.0078125, %v2603_v12 }
 0xefb   : > { %v2607_v41 = vadd.f32 1e-05, %v2605_v63 }
 0xefd   : > { %3639 = vrsqrt.f32 %v2607_v41 }
 0xf03   : > { %v3638_v13 = vpop.eup %3637 }
 0xf04   : > { %v2610_v14 = vmul.f32 %v3638_v13, %v2595_v5 }
 0xf06   : > { %v2619_v16 = vmul.f32 %v3085_v57, %v2610_v14 }
 0xf07   : > { %v3640_v19 = vpop.eup %3639 }
 0xf08   : > { %v2628_v4 = vadd.f32 %v3086_v15, %v2619_v16  ;;  %v2611_v45 = vmul.f32 %v3640_v19, %v2596_v9  ;;  %2635 = sbr.rel (%p3087_p1) target bundleno = 4380 (0x111c), region = 108 }
 0xf0a   : > { %2630 = vst [vmem:[#allocation2] sm:$0xff] %v2628_v4  ;;  %v2620_v20 = vmul.f32 %v3085_v57, %v2611_v45  ;;  %v2636_v47 = vsel (!%p3087_p1), %vm1347_vm7, %v2628_v4, 0.0 }
 0xf0b   : > { %2637 = vadd.xlane.f32.xlu0 (!%p3087_p1), %v2636_v47 }
 0xf0c   : > { %v2629_v44 = vadd.f32 %v3086_v15, %v2620_v20 }
 0xf0e   : > { %2631 = vst [vmem:[#allocation2 + $0x8] sm:$0x1] %v2629_v44 }
 0xf98   : > { %v2638_v18 = vpop.xlane.xlu0 %2637 }
 0xf99   : > { %v2639_v24 = vmul.f32 0.0078125, %v2638_v18 }
 0xf9b   : > { %v2640_v26 = vsub.f32 %v2628_v4, %v2639_v24 }
 0xf9d   : > { %v2641_v21 = vmul.f32 %v2640_v26, %v2640_v26 }
 0xf9f   : > { %v2642_v27 = vsel %vm1347_vm7, %v2641_v21, 0.0 }
 0xfa0   : > { %2643 = vadd.xlane.f32.xlu0 %v2642_v27 }
0x102d   : > { %v2644_v34 = vpop.xlane.xlu0 %2643 }
0x102e   : > { %v2645_v35 = vmul.f32 0.0078125, %v2644_v34 }
0x1030   : > { %v2646_v36 = vadd.f32 1e-05, %v2645_v35 }
0x1032   : > { %3649 = vrsqrt.f32 %v2646_v36 }
0x103c   : > { %v3650_v37 = vpop.eup %3649 }
0x103d   : > { %v2648_v39 = vmul.f32 %v3650_v37, %v2640_v26 }
0x103f   : > { %v2650_v48 = vmul.f32 %v2649_v38, %v2648_v39 }
0x1041   : > { %v2652_v61 = vadd.f32 %v2651_v50, %v2650_v48 }
0x1043   : > { %v2653_v52 = vpack.c.bf16 %v2652_v61, %v2652_v61 }
0x1045   : > { %3325 = vmatmul.mubr.bf16.vlgmr.msra.gmra.mrb[0].mxu0 %v2653_v52 }
0x1118   : > { %v2753_v42 = vpop.f32.mrb[0].mxu0 }
0x1119   : > { %v2754_v43 = vadd.f32 %v2753_v42, %v2670_v25  ;;  %v3326_v46 = vpop.f32.mrb[1].mxu0 }
0x111a   : > { %v2756_v53 = vpop.f32.mrb[2].mxu0 }
0x111b   : > { %2759 = vst [vmem:[%s4006_s19] sm:$0x1] %v2754_v43  ;;  %v3327_v54 = vpop.f32.mrb[3].mxu0 }
0x111c PF: > { %s4523_s29 = sld [smem:[#allocation9_spill]]  ;;  %s4525_s24 = sld [smem:[#allocation31_spill]] }
0x111d   : > { %s2773_s3 = sshll.u32 %s4006_s19, 4  ;;  %s4527_s28 = sand.u32 1, %s3721_s22   ;;  %s2774_s3 = int_to_ptr.vmem [resolvable:$true] %s2773_s3 }
0x111e   : > { %s2761_s2 = scalar_lea.sflag [#allocation4], %s4527_s28  ;;  %s3651_s6 = scalar_lea.vmem %s2774_s3, 16 }
0x111f   : > { %p3652_p2 = scmp.ne.s32.totalorder %s2774_s3, %s3651_s6  ;;  %s3758_s25 = smov [#allocation3]  }
0x1120   : > { %s3655_s10 = sshll.u32 %s3758_s25, 4  ;;  %s3656_s10 = int_to_ptr.vmem [resolvable:$false] %s3655_s10 }
0x1121   : > { %p3653_p4 = pnand %p3652_p2, %p3913_p3  ;;  %s3657_s1 = scalar_lea.vmem %s3656_s10, 32 }
0x1122   : > { %s3096_s4 = sshll.u32 %s4523_s29, 4  ;;  %s4526_s30 = smov %s4525_s24 }
0x1123   : > { %s4385_s26 = scalar_lea.hbm %s4525_s24, %s3096_s4  ;;  %p3654_p5 = pneg %p3653_p4 }
0x1124   : > { %p3658_p6 = scmp.lt.s32.totalorder %s2774_s3, %s3656_s10  ;;  %p3659_p7 = scmp.lt.s32.totalorder %s3657_s1, %s3651_s6 }
0x1126   : > { %p3660_p8 = por %p3659_p7, %p3658_p6 }
0x1128   : > { %p3661_p10 = pnand %p3660_p8, %p3654_p5 }
0x112a   : > { %3664 = shalt.err (!%p3661_p10)
}
0x112b   : > { %s3665_s19 = scalar_lea.hbm %s4385_s26, 16  ;;  %s3669_s18 = scalar_lea.hbm %s4526_s30, 32 }
0x112c   : > { %p3666_p11 = scmp.ne.s32.totalorder %s4385_s26, %s3665_s19  ;;  %p3670_p0 = scmp.lt.u32.totalorder %s4385_s26, %s4526_s30 }
0x112d   : > { %p3671_p1 = scmp.lt.u32.totalorder %s3669_s18, %s3665_s19  ;;  %p3673_p4 = scmp.lt.u32.totalorder %s3665_s19, %s4385_s26 }
0x112e   : > { %p3667_p12 = pnand %p3666_p11, %p3913_p3 }
0x112f   : > { %p3672_p2 = por %p3671_p1, %p3670_p0 }
0x1130   : > { %p3668_p13 = pneg %p3667_p12 }
0x1131   : > { %p3674_p5 = por %p3673_p4, %p3672_p2 }
0x1133   : > { %p3675_p6 = pnand %p3674_p5, %p3668_p13 }
0x1135   : > { %3678 = shalt.err (!%p3675_p6)
}
0x1136   : > { %3378 = dma.vmem_to_hbm [thread:$0]  (%p3913_p3), %s2774_s3, 16, %s4385_s26, %s2761_s2  }
0x1137 PF: > { %s4528_s5 = sld [smem:[#allocation12_spill]]  ;;  %s4529_s16 = sld [smem:[#allocation6_spill]] }
0x113d   : > { %p3384_p7 = scmp.ge.s32.totalorder %s4528_s5, 2  ;;  %s2785_s28 = sand.u32 1, %s4529_s16  }
0x113e   : > { %s2786_s6 = scalar_lea.sflag [#allocation4], %s2785_s28 }
0x113f   : > { %p3381_p8 = pnand %p3384_p7, %p3923_p9 }
0x1141   : > { %3712 = dma.done.wait (!%p3381_p8), %s2786_s6, 16  }
0x1142   : > { %3714 = vsyncadd (!%p3381_p8), %s2786_s6, 4294967280  ;;  %s33_s26 = sadd.s32 1, %s4528_s5   ;;  %s4531_s25 = sld [smem:[#allocation7_spill]] }
0x1143   : > { %p30_p10 = scmp.ge.s32.totalorder %s33_s26, 6   ;;  %s4532_s23 = sld [smem:[#allocation17_spill]] }
0x1144   : > { %s4533_s24 = sld [smem:[#allocation10_spill]]  ;;  %s4534_s2 = sld [smem:[#allocation11_spill]] }
0x1145   : > { %s4535_s17 = sld [smem:[#allocation13_spill]]  ;;  %s4536_s3 = sld [smem:[#allocation15_spill]] }
0x1146   : > { %s4537_s1 = smov %s3721_s22  ;;  %32 = sbr.rel (!%p30_p10) target bundleno = 19 (0x13), region = 179 }
0x1148   : > { %s4538_s22 = smov %s4531_s25 }
0x114b   : > { %s4539_s25 = smov %s4535_s17 }
0x114d   :  { %2790 = vsyncpa [#allocation4], 1 }
0x114e   :  { %2792 = vsyncpa [#allocation4 + $0x1], 1 }

</bundles_post_ra>
